<compile_context>
chip_gen: v6e
topology: v6e:2x2x1
jax: 0.10.0
libtpu: 0.0.40
codegen_flags: <defaults>
</compile_context>

<pallas_src>
import functools
import math

import numpy as np
import jax
import jax.numpy as jnp
from jax import lax
from jax.experimental import pallas as pl
from jax.experimental.pallas import tpu as pltpu

LANES = 128  # pad all channel dims to this -> lane-dense vregs and stores


def conv2d_size_out(size, kernel_size, stride):
    return (size - (kernel_size - 1) - 1) // stride + 1


# ----------------------- constant selection matrices ----------------------- #

def _selection_matrix(h_in, w_in, k, stride, dtype=jnp.bfloat16):
    """0/1 matrix S with S[(ki*k+kj)*Ho*Wo + oh*Wo + ow, h*w_in + w] = 1 iff
    (h, w) == (stride*oh + ki, stride*ow + kj).  Left-multiplying the (H*W, C)
    activation map by S yields every im2col patch row -- gather/stride free."""
    ho, wo = conv2d_size_out(h_in, k, stride), conv2d_size_out(w_in, k, stride)
    s = np.zeros((k * k * ho * wo, h_in * w_in), np.float32)
    for ki in range(k):
        for kj in range(k):
            for oh in range(ho):
                for ow in range(wo):
                    r = (ki * k + kj) * ho * wo + oh * wo + ow
                    s[r, (stride * oh + ki) * w_in + (stride * ow + kj)] = 1.0
    return jnp.asarray(s, dtype)


# ------------------------------ Pallas kernel ------------------------------ #

def _fused_kernel(p1_ref, w1_ref, b1_ref, s2_ref, w2_ref, b2_ref,
                  s3_ref, w3_ref, b3_ref, wf_ref, bf_ref, o_ref,
                  *, q2, q3, t2, t3):
    f32, bf16 = jnp.float32, jnp.bfloat16

    # conv1 + ReLU: one GEMM over this sample's pre-extracted patches.
    a1 = jnp.dot(p1_ref[0], w1_ref[...], preferred_element_type=f32)
    a1 = jnp.maximum(a1 + b1_ref[...], 0.0).astype(bf16)                     # (P1, 128)

    # conv2 + ReLU: patch rows via constant 0/1 selection matmul (MXU), then
    # K*K partial GEMMs accumulated in f32.
    p2 = jnp.dot(s2_ref[...], a1, preferred_element_type=f32).astype(bf16)   # (t2*q2, 128)
    acc2 = jnp.zeros((q2, LANES), f32)
    for t in range(t2):
        acc2 += jnp.dot(p2[t * q2:(t + 1) * q2, :], w2_ref[t],
                        preferred_element_type=f32)
    a2 = jnp.maximum(acc2 + b2_ref[...], 0.0).astype(bf16)                   # (q2, 128)

    # conv3 + ReLU (same scheme).
    p3 = jnp.dot(s3_ref[...], a2, preferred_element_type=f32).astype(bf16)   # (t3*q3, 128)
    acc3 = jnp.zeros((q3, LANES), f32)
    for t in range(t3):
        acc3 += jnp.dot(p3[t * q3:(t + 1) * q3, :], w3_ref[t],
                        preferred_element_type=f32)
    a3 = jnp.maximum(acc3 + b3_ref[...], 0.0).astype(bf16)                   # (q3, 128)

    # FC + ReLU: PyTorch's NCHW flatten order is baked into wf at prep time.
    accf = jnp.zeros((1, o_ref.shape[-1]), f32)
    for r in range(q3):
        accf += jnp.dot(a3[r:r + 1, :], wf_ref[r], preferred_element_type=f32)
    o_ref[0] = jnp.maximum(accf + bf_ref[...], 0.0)


# --------------------------- wrapper-side glue ------------------------------ #

def _conv1_patches(x_nhwc, ho, wo, k, stride):
    """im2col for the first conv only, via strided slices (no gather)."""
    n, _, _, c = x_nhwc.shape
    pieces = []
    for ki in range(k):
        for kj in range(k):
            pieces.append(lax.slice(
                x_nhwc,
                (0, ki, kj, 0),
                (n, ki + (ho - 1) * stride + 1, kj + (wo - 1) * stride + 1, c),
                (1, stride, stride, 1)))                                     # (n,ho,wo,c)
    p = jnp.stack(pieces, axis=3)                                            # (n,ho,wo,k*k,c)
    return p.reshape(n, ho * wo, k * k * c)                                  # (ki,kj,c) order


def actor_cnn_emb_forward(s_nchw, prep):
    n, c_in, h_in, w_in = s_nchw.shape
    h1, w1 = conv2d_size_out(h_in, 8, 4), conv2d_size_out(w_in, 8, 4)
    h2, w2 = conv2d_size_out(h1, 4, 2), conv2d_size_out(w1, 4, 2)
    h3, w3 = conv2d_size_out(h2, 3, 1), conv2d_size_out(w2, 3, 1)
    p1, q2, q3 = h1 * w1, h2 * w2, h3 * w3
    k1 = 8 * 8 * c_in
    emb = prep["bf"].shape[-1]

    # Thin XLA glue (first layer only): layout transpose + strided-slice im2col.
    x = jnp.transpose(s_nchw, (0, 2, 3, 1)).astype(jnp.bfloat16)
    patches = _conv1_patches(x, h1, w1, k=8, stride=4)                       # (n, p1, k1)

    kernel = functools.partial(_fused_kernel, q2=q2, q3=q3, t2=16, t3=9)

    def full_spec(shape):
        return pl.BlockSpec(shape, lambda i: (0,) * len(shape))

    out = pl.pallas_call(
        kernel,
        out_shape=jax.ShapeDtypeStruct((n, 1, emb), jnp.float32),
        grid=(n,),
        in_specs=[
            pl.BlockSpec((1, p1, k1), lambda i: (i, 0, 0)),
            full_spec(prep["w1"].shape), full_spec(prep["b1"].shape),
            full_spec(prep["s2"].shape), full_spec(prep["w2"].shape), full_spec(prep["b2"].shape),
            full_spec(prep["s3"].shape), full_spec(prep["w3"].shape), full_spec(prep["b3"].shape),
            full_spec(prep["wf"].shape), full_spec(prep["bf"].shape),
        ],
        out_specs=pl.BlockSpec((1, 1, emb), lambda i: (i, 0, 0)),
        compiler_params=pltpu.CompilerParams(dimension_semantics=("parallel",)),
    )(patches, prep["w1"], prep["b1"], prep["s2"], prep["w2"], prep["b2"],
      prep["s3"], prep["w3"], prep["b3"], prep["wf"], prep["bf"])
    return out.reshape(n, emb)


# ------------------------------- parameters -------------------------------- #

def init_params(key, s_dim, emb_dim):
    """PyTorch-default-style init: U(-1/sqrt(fan_in), 1/sqrt(fan_in))."""
    c_in, h_in, w_in = s_dim
    h = conv2d_size_out(conv2d_size_out(conv2d_size_out(h_in, 8, 4), 4, 2), 3, 1)
    w = conv2d_size_out(conv2d_size_out(conv2d_size_out(w_in, 8, 4), 4, 2), 3, 1)
    flat = h * w * 64
    ks = jax.random.split(key, 8)

    def u(k, shape, fan_in):
        bound = 1.0 / math.sqrt(fan_in)
        return jax.random.uniform(k, shape, jnp.float32, -bound, bound)

    return {
        "w1": u(ks[0], (32, c_in, 8, 8), c_in * 8 * 8),
        "b1": u(ks[1], (32,), c_in * 8 * 8),
        "w2": u(ks[2], (64, 32, 4, 4), 32 * 4 * 4),
        "b2": u(ks[3], (64,), 32 * 4 * 4),
        "w3": u(ks[4], (64, 64, 3, 3), 64 * 3 * 3),
        "b3": u(ks[5], (64,), 64 * 3 * 3),
        "w_fc": u(ks[6], (emb_dim, flat), flat),
        "b_fc": u(ks[7], (emb_dim,), flat),
    }


def prep_params(params, s_dim, emb_dim):
    """One-time layout prep: GEMM-form weights, 128-lane channel padding,
    NCHW-flatten baked into the FC weight, constant selection matrices."""
    c_in, h_in, w_in = s_dim
    h1, w1 = conv2d_size_out(h_in, 8, 4), conv2d_size_out(w_in, 8, 4)
    h2, w2 = conv2d_size_out(h1, 4, 2), conv2d_size_out(w1, 4, 2)
    h3, w3 = conv2d_size_out(h2, 3, 1), conv2d_size_out(w2, 3, 1)

    def pad_to_lanes(x, axis):
        pad = LANES - x.shape[axis]
        if pad <= 0:
            return x
        widths = [(0, 0)] * x.ndim
        widths[axis] = (0, pad)
        return jnp.pad(x, widths)

    def conv_w(w, k):
        cout, cin = w.shape[0], w.shape[1]
        wm = jnp.transpose(w, (2, 3, 1, 0)).reshape(k * k, cin, cout)
        return pad_to_lanes(pad_to_lanes(wm, 1), 2).astype(jnp.bfloat16)     # (k*k,128,128)

    def conv_b(b):
        return pad_to_lanes(b, 0).reshape(1, LANES).astype(jnp.float32)

    w1m = jnp.transpose(params["w1"], (2, 3, 1, 0)).reshape(8 * 8 * c_in, 32)
    w1m = pad_to_lanes(w1m, 1).astype(jnp.bfloat16)                          # (64*cin,128)

    wf = params["w_fc"].reshape(emb_dim, 64, h3 * w3)                        # NCHW flatten
    wf = jnp.transpose(wf, (2, 1, 0))                                        # (r, c, emb)
    wf = pad_to_lanes(wf, 1).astype(jnp.bfloat16)                            # (r, 128, emb)

    return {
        "w1": w1m, "b1": conv_b(params["b1"]),
        "w2": conv_w(params["w2"], 4), "b2": conv_b(params["b2"]),
        "w3": conv_w(params["w3"], 3), "b3": conv_b(params["b3"]),
        "wf": wf, "bf": params["b_fc"].reshape(1, emb_dim).astype(jnp.float32),
        "s2": _selection_matrix(h1, w1, 4, 2),                               # (16*h2*w2, h1*w1)
        "s3": _selection_matrix(h2, w2, 3, 1),                               # (9*h3*w3,  h2*w2)
    }


# --------------------------- pure-JAX reference ----------------------------- #

def reference_forward(s_nchw, params):
    def conv(x, w, b, stride):
        y = lax.conv_general_dilated(
            x, w, window_strides=(stride, stride), padding="VALID",
            dimension_numbers=("NCHW", "OIHW", "NCHW"))
        return jnp.maximum(y + b[None, :, None, None], 0.0)

    x = conv(s_nchw, params["w1"], params["b1"], 4)
    x = conv(x, params["w2"], params["b2"], 2)
    x = conv(x, params["w3"], params["b3"], 1)
    x = x.reshape(x.shape[0], -1)
    return jnp.maximum(x @ params["w_fc"].T + params["b_fc"], 0.0)


# ---------------------------------- main ------------------------------------ #

if __name__ == "__main__":
    s_dim = (4, 44, 44)       # (C, H, W) — small but valid for the 8/4/3 conv chain
    emb_dim = 128
    batch = 2

    key = jax.random.PRNGKey(0)
    k_inp, k_par = jax.random.split(key)
    s = jax.random.normal(k_inp, (batch,) + s_dim, dtype=jnp.float32)
    params = init_params(k_par, s_dim, emb_dim)
    prep = prep_params(params, s_dim, emb_dim)

    fwd = jax.jit(actor_cnn_emb_forward)
    out = jax.block_until_ready(fwd(s, prep))
    ref = reference_forward(s, params)

    assert out.shape == (batch, emb_dim), out.shape
    max_err = float(jnp.max(jnp.abs(out - ref)))
    # bf16 MXU operands (f32 accumulation) -> loosened tolerance vs pure-f32 reference.
    assert jnp.allclose(out, ref, atol=2e-2, rtol=2e-2), max_err
    print("KERNEL_OK")
</pallas_src>

<mosaic_0001>
module attributes {stable_mosaic.version = 11 : i64} {
  func.func @_fused_kernel(%arg0: i32, %arg1: memref<1x100x256xbf16, #tpu.memory_space<vmem>>, %arg2: memref<256x128xbf16, #tpu.memory_space<vmem>>, %arg3: memref<1x128xf32, #tpu.memory_space<vmem>>, %arg4: memref<256x100xbf16, #tpu.memory_space<vmem>>, %arg5: memref<16x128x128xbf16, #tpu.memory_space<vmem>>, %arg6: memref<1x128xf32, #tpu.memory_space<vmem>>, %arg7: memref<36x16xbf16, #tpu.memory_space<vmem>>, %arg8: memref<9x128x128xbf16, #tpu.memory_space<vmem>>, %arg9: memref<1x128xf32, #tpu.memory_space<vmem>>, %arg10: memref<4x128x128xbf16, #tpu.memory_space<vmem>>, %arg11: memref<1x128xf32, #tpu.memory_space<vmem>>, %arg12: memref<1x1x128xf32, #tpu.memory_space<vmem>>) attributes {dimension_semantics = [#tpu.dimension_semantics<parallel>], iteration_bounds = array<i64: 2>, scalar_prefetch = 0 : i64, scratch_operands = 0 : i64, tpu.core_type = #tpu.core_type<tc>, window_params = [{transform_indices = @transform_0, window_bounds = array<i64: 1, 100, 256>}, {pipeline_mode = #tpu.pipeline_mode<synchronous>, transform_indices = @transform_1, window_bounds = array<i64: 256, 128>}, {pipeline_mode = #tpu.pipeline_mode<synchronous>, transform_indices = @transform_2, window_bounds = array<i64: 1, 128>}, {pipeline_mode = #tpu.pipeline_mode<synchronous>, transform_indices = @transform_3, window_bounds = array<i64: 256, 100>}, {pipeline_mode = #tpu.pipeline_mode<synchronous>, transform_indices = @transform_4, window_bounds = array<i64: 16, 128, 128>}, {pipeline_mode = #tpu.pipeline_mode<synchronous>, transform_indices = @transform_5, window_bounds = array<i64: 1, 128>}, {pipeline_mode = #tpu.pipeline_mode<synchronous>, transform_indices = @transform_6, window_bounds = array<i64: 36, 16>}, {pipeline_mode = #tpu.pipeline_mode<synchronous>, transform_indices = @transform_7, window_bounds = array<i64: 9, 128, 128>}, {pipeline_mode = #tpu.pipeline_mode<synchronous>, transform_indices = @transform_8, window_bounds = array<i64: 1, 128>}, {pipeline_mode = #tpu.pipeline_mode<synchronous>, transform_indices = @transform_9, window_bounds = array<i64: 4, 128, 128>}, {pipeline_mode = #tpu.pipeline_mode<synchronous>, transform_indices = @transform_10, window_bounds = array<i64: 1, 128>}, {transform_indices = @transform_11, window_bounds = array<i64: 1, 1, 128>}]} {
    %c0 = arith.constant 0 : index
    %c0_0 = arith.constant 0 : index
    %c0_1 = arith.constant 0 : index
    %0 = vector.load %arg1[%c0, %c0_0, %c0_1] : memref<1x100x256xbf16, #tpu.memory_space<vmem>>, vector<1x100x256xbf16>
    %1 = vector.shape_cast %0 : vector<1x100x256xbf16> to vector<100x256xbf16>
    %c0_2 = arith.constant 0 : index
    %c0_3 = arith.constant 0 : index
    %2 = vector.load %arg2[%c0_2, %c0_3] : memref<256x128xbf16, #tpu.memory_space<vmem>>, vector<256x128xbf16>
    %cst = arith.constant dense<0.000000e+00> : vector<100x128xf32>
    %3 = tpu.matmul %1, %2, %cst {dimension_numbers = #tpu.dot_dimension_numbers<[1], [0], [0], [1], [0, 0, 1, 1], [], []>} : vector<100x256xbf16>, vector<256x128xbf16>, vector<100x128xf32> -> vector<100x128xf32>
    %c0_4 = arith.constant 0 : index
    %c0_5 = arith.constant 0 : index
    %4 = vector.load %arg3[%c0_4, %c0_5] : memref<1x128xf32, #tpu.memory_space<vmem>>, vector<1x128xf32>
    %5 = vector.broadcast %4 : vector<1x128xf32> to vector<100x128xf32>
    %6 = arith.addf %3, %5 : vector<100x128xf32>
    %cst_6 = arith.constant 0.000000e+00 : f32
    %7 = vector.broadcast %cst_6 : f32 to vector<100x128xf32>
    %8 = arith.maximumf %6, %7 : vector<100x128xf32>
    %9 = arith.truncf %8 : vector<100x128xf32> to vector<100x128xbf16>
    %c0_7 = arith.constant 0 : index
    %c0_8 = arith.constant 0 : index
    %10 = vector.load %arg4[%c0_7, %c0_8] : memref<256x100xbf16, #tpu.memory_space<vmem>>, vector<256x100xbf16>
    %cst_9 = arith.constant dense<0.000000e+00> : vector<256x128xf32>
    %11 = tpu.matmul %10, %9, %cst_9 {dimension_numbers = #tpu.dot_dimension_numbers<[1], [0], [0], [1], [0, 0, 1, 1], [], []>} : vector<256x100xbf16>, vector<100x128xbf16>, vector<256x128xf32> -> vector<256x128xf32>
    %12 = arith.truncf %11 : vector<256x128xf32> to vector<256x128xbf16>
    %cst_10 = arith.constant 0.000000e+00 : f32
    %13 = vector.broadcast %cst_10 : f32 to vector<16x128xf32>
    %14 = vector.extract_strided_slice %12 {offsets = [0, 0], sizes = [16, 128], strides = [1, 1]} : vector<256x128xbf16> to vector<16x128xbf16>
    %c0_11 = arith.constant 0 : index
    %c0_12 = arith.constant 0 : index
    %c0_13 = arith.constant 0 : index
    %15 = vector.load %arg5[%c0_11, %c0_12, %c0_13] : memref<16x128x128xbf16, #tpu.memory_space<vmem>>, vector<1x128x128xbf16>
    %16 = vector.shape_cast %15 : vector<1x128x128xbf16> to vector<128x128xbf16>
    %cst_14 = arith.constant dense<0.000000e+00> : vector<16x128xf32>
    %17 = tpu.matmul %14, %16, %cst_14 {dimension_numbers = #tpu.dot_dimension_numbers<[1], [0], [0], [1], [0, 0, 1, 1], [], []>} : vector<16x128xbf16>, vector<128x128xbf16>, vector<16x128xf32> -> vector<16x128xf32>
    %18 = arith.addf %13, %17 : vector<16x128xf32>
    %19 = vector.extract_strided_slice %12 {offsets = [16, 0], sizes = [16, 128], strides = [1, 1]} : vector<256x128xbf16> to vector<16x128xbf16>
    %c1 = arith.constant 1 : index
    %c0_15 = arith.constant 0 : index
    %c0_16 = arith.constant 0 : index
    %20 = vector.load %arg5[%c1, %c0_15, %c0_16] : memref<16x128x128xbf16, #tpu.memory_space<vmem>>, vector<1x128x128xbf16>
    %21 = vector.shape_cast %20 : vector<1x128x128xbf16> to vector<128x128xbf16>
    %cst_17 = arith.constant dense<0.000000e+00> : vector<16x128xf32>
    %22 = tpu.matmul %19, %21, %cst_17 {dimension_numbers = #tpu.dot_dimension_numbers<[1], [0], [0], [1], [0, 0, 1, 1], [], []>} : vector<16x128xbf16>, vector<128x128xbf16>, vector<16x128xf32> -> vector<16x128xf32>
    %23 = arith.addf %18, %22 : vector<16x128xf32>
    %24 = vector.extract_strided_slice %12 {offsets = [32, 0], sizes = [16, 128], strides = [1, 1]} : vector<256x128xbf16> to vector<16x128xbf16>
    %c2 = arith.constant 2 : index
    %c0_18 = arith.constant 0 : index
    %c0_19 = arith.constant 0 : index
    %25 = vector.load %arg5[%c2, %c0_18, %c0_19] : memref<16x128x128xbf16, #tpu.memory_space<vmem>>, vector<1x128x128xbf16>
    %26 = vector.shape_cast %25 : vector<1x128x128xbf16> to vector<128x128xbf16>
    %cst_20 = arith.constant dense<0.000000e+00> : vector<16x128xf32>
    %27 = tpu.matmul %24, %26, %cst_20 {dimension_numbers = #tpu.dot_dimension_numbers<[1], [0], [0], [1], [0, 0, 1, 1], [], []>} : vector<16x128xbf16>, vector<128x128xbf16>, vector<16x128xf32> -> vector<16x128xf32>
    %28 = arith.addf %23, %27 : vector<16x128xf32>
    %29 = vector.extract_strided_slice %12 {offsets = [48, 0], sizes = [16, 128], strides = [1, 1]} : vector<256x128xbf16> to vector<16x128xbf16>
    %c3 = arith.constant 3 : index
    %c0_21 = arith.constant 0 : index
    %c0_22 = arith.constant 0 : index
    %30 = vector.load %arg5[%c3, %c0_21, %c0_22] : memref<16x128x128xbf16, #tpu.memory_space<vmem>>, vector<1x128x128xbf16>
    %31 = vector.shape_cast %30 : vector<1x128x128xbf16> to vector<128x128xbf16>
    %cst_23 = arith.constant dense<0.000000e+00> : vector<16x128xf32>
    %32 = tpu.matmul %29, %31, %cst_23 {dimension_numbers = #tpu.dot_dimension_numbers<[1], [0], [0], [1], [0, 0, 1, 1], [], []>} : vector<16x128xbf16>, vector<128x128xbf16>, vector<16x128xf32> -> vector<16x128xf32>
    %33 = arith.addf %28, %32 : vector<16x128xf32>
    %34 = vector.extract_strided_slice %12 {offsets = [64, 0], sizes = [16, 128], strides = [1, 1]} : vector<256x128xbf16> to vector<16x128xbf16>
    %c4 = arith.constant 4 : index
    %c0_24 = arith.constant 0 : index
    %c0_25 = arith.constant 0 : index
    %35 = vector.load %arg5[%c4, %c0_24, %c0_25] : memref<16x128x128xbf16, #tpu.memory_space<vmem>>, vector<1x128x128xbf16>
    %36 = vector.shape_cast %35 : vector<1x128x128xbf16> to vector<128x128xbf16>
    %cst_26 = arith.constant dense<0.000000e+00> : vector<16x128xf32>
    %37 = tpu.matmul %34, %36, %cst_26 {dimension_numbers = #tpu.dot_dimension_numbers<[1], [0], [0], [1], [0, 0, 1, 1], [], []>} : vector<16x128xbf16>, vector<128x128xbf16>, vector<16x128xf32> -> vector<16x128xf32>
    %38 = arith.addf %33, %37 : vector<16x128xf32>
    %39 = vector.extract_strided_slice %12 {offsets = [80, 0], sizes = [16, 128], strides = [1, 1]} : vector<256x128xbf16> to vector<16x128xbf16>
    %c5 = arith.constant 5 : index
    %c0_27 = arith.constant 0 : index
    %c0_28 = arith.constant 0 : index
    %40 = vector.load %arg5[%c5, %c0_27, %c0_28] : memref<16x128x128xbf16, #tpu.memory_space<vmem>>, vector<1x128x128xbf16>
    %41 = vector.shape_cast %40 : vector<1x128x128xbf16> to vector<128x128xbf16>
    %cst_29 = arith.constant dense<0.000000e+00> : vector<16x128xf32>
    %42 = tpu.matmul %39, %41, %cst_29 {dimension_numbers = #tpu.dot_dimension_numbers<[1], [0], [0], [1], [0, 0, 1, 1], [], []>} : vector<16x128xbf16>, vector<128x128xbf16>, vector<16x128xf32> -> vector<16x128xf32>
    %43 = arith.addf %38, %42 : vector<16x128xf32>
    %44 = vector.extract_strided_slice %12 {offsets = [96, 0], sizes = [16, 128], strides = [1, 1]} : vector<256x128xbf16> to vector<16x128xbf16>
    %c6 = arith.constant 6 : index
    %c0_30 = arith.constant 0 : index
    %c0_31 = arith.constant 0 : index
    %45 = vector.load %arg5[%c6, %c0_30, %c0_31] : memref<16x128x128xbf16, #tpu.memory_space<vmem>>, vector<1x128x128xbf16>
    %46 = vector.shape_cast %45 : vector<1x128x128xbf16> to vector<128x128xbf16>
    %cst_32 = arith.constant dense<0.000000e+00> : vector<16x128xf32>
    %47 = tpu.matmul %44, %46, %cst_32 {dimension_numbers = #tpu.dot_dimension_numbers<[1], [0], [0], [1], [0, 0, 1, 1], [], []>} : vector<16x128xbf16>, vector<128x128xbf16>, vector<16x128xf32> -> vector<16x128xf32>
    %48 = arith.addf %43, %47 : vector<16x128xf32>
    %49 = vector.extract_strided_slice %12 {offsets = [112, 0], sizes = [16, 128], strides = [1, 1]} : vector<256x128xbf16> to vector<16x128xbf16>
    %c7 = arith.constant 7 : index
    %c0_33 = arith.constant 0 : index
    %c0_34 = arith.constant 0 : index
    %50 = vector.load %arg5[%c7, %c0_33, %c0_34] : memref<16x128x128xbf16, #tpu.memory_space<vmem>>, vector<1x128x128xbf16>
    %51 = vector.shape_cast %50 : vector<1x128x128xbf16> to vector<128x128xbf16>
    %cst_35 = arith.constant dense<0.000000e+00> : vector<16x128xf32>
    %52 = tpu.matmul %49, %51, %cst_35 {dimension_numbers = #tpu.dot_dimension_numbers<[1], [0], [0], [1], [0, 0, 1, 1], [], []>} : vector<16x128xbf16>, vector<128x128xbf16>, vector<16x128xf32> -> vector<16x128xf32>
    %53 = arith.addf %48, %52 : vector<16x128xf32>
    %54 = vector.extract_strided_slice %12 {offsets = [128, 0], sizes = [16, 128], strides = [1, 1]} : vector<256x128xbf16> to vector<16x128xbf16>
    %c8 = arith.constant 8 : index
    %c0_36 = arith.constant 0 : index
    %c0_37 = arith.constant 0 : index
    %55 = vector.load %arg5[%c8, %c0_36, %c0_37] : memref<16x128x128xbf16, #tpu.memory_space<vmem>>, vector<1x128x128xbf16>
    %56 = vector.shape_cast %55 : vector<1x128x128xbf16> to vector<128x128xbf16>
    %cst_38 = arith.constant dense<0.000000e+00> : vector<16x128xf32>
    %57 = tpu.matmul %54, %56, %cst_38 {dimension_numbers = #tpu.dot_dimension_numbers<[1], [0], [0], [1], [0, 0, 1, 1], [], []>} : vector<16x128xbf16>, vector<128x128xbf16>, vector<16x128xf32> -> vector<16x128xf32>
    %58 = arith.addf %53, %57 : vector<16x128xf32>
    %59 = vector.extract_strided_slice %12 {offsets = [144, 0], sizes = [16, 128], strides = [1, 1]} : vector<256x128xbf16> to vector<16x128xbf16>
    %c9 = arith.constant 9 : index
    %c0_39 = arith.constant 0 : index
    %c0_40 = arith.constant 0 : index
    %60 = vector.load %arg5[%c9, %c0_39, %c0_40] : memref<16x128x128xbf16, #tpu.memory_space<vmem>>, vector<1x128x128xbf16>
    %61 = vector.shape_cast %60 : vector<1x128x128xbf16> to vector<128x128xbf16>
    %cst_41 = arith.constant dense<0.000000e+00> : vector<16x128xf32>
    %62 = tpu.matmul %59, %61, %cst_41 {dimension_numbers = #tpu.dot_dimension_numbers<[1], [0], [0], [1], [0, 0, 1, 1], [], []>} : vector<16x128xbf16>, vector<128x128xbf16>, vector<16x128xf32> -> vector<16x128xf32>
    %63 = arith.addf %58, %62 : vector<16x128xf32>
    %64 = vector.extract_strided_slice %12 {offsets = [160, 0], sizes = [16, 128], strides = [1, 1]} : vector<256x128xbf16> to vector<16x128xbf16>
    %c10 = arith.constant 10 : index
    %c0_42 = arith.constant 0 : index
    %c0_43 = arith.constant 0 : index
    %65 = vector.load %arg5[%c10, %c0_42, %c0_43] : memref<16x128x128xbf16, #tpu.memory_space<vmem>>, vector<1x128x128xbf16>
    %66 = vector.shape_cast %65 : vector<1x128x128xbf16> to vector<128x128xbf16>
    %cst_44 = arith.constant dense<0.000000e+00> : vector<16x128xf32>
    %67 = tpu.matmul %64, %66, %cst_44 {dimension_numbers = #tpu.dot_dimension_numbers<[1], [0], [0], [1], [0, 0, 1, 1], [], []>} : vector<16x128xbf16>, vector<128x128xbf16>, vector<16x128xf32> -> vector<16x128xf32>
    %68 = arith.addf %63, %67 : vector<16x128xf32>
    %69 = vector.extract_strided_slice %12 {offsets = [176, 0], sizes = [16, 128], strides = [1, 1]} : vector<256x128xbf16> to vector<16x128xbf16>
    %c11 = arith.constant 11 : index
    %c0_45 = arith.constant 0 : index
    %c0_46 = arith.constant 0 : index
    %70 = vector.load %arg5[%c11, %c0_45, %c0_46] : memref<16x128x128xbf16, #tpu.memory_space<vmem>>, vector<1x128x128xbf16>
    %71 = vector.shape_cast %70 : vector<1x128x128xbf16> to vector<128x128xbf16>
    %cst_47 = arith.constant dense<0.000000e+00> : vector<16x128xf32>
    %72 = tpu.matmul %69, %71, %cst_47 {dimension_numbers = #tpu.dot_dimension_numbers<[1], [0], [0], [1], [0, 0, 1, 1], [], []>} : vector<16x128xbf16>, vector<128x128xbf16>, vector<16x128xf32> -> vector<16x128xf32>
    %73 = arith.addf %68, %72 : vector<16x128xf32>
    %74 = vector.extract_strided_slice %12 {offsets = [192, 0], sizes = [16, 128], strides = [1, 1]} : vector<256x128xbf16> to vector<16x128xbf16>
    %c12 = arith.constant 12 : index
    %c0_48 = arith.constant 0 : index
    %c0_49 = arith.constant 0 : index
    %75 = vector.load %arg5[%c12, %c0_48, %c0_49] : memref<16x128x128xbf16, #tpu.memory_space<vmem>>, vector<1x128x128xbf16>
    %76 = vector.shape_cast %75 : vector<1x128x128xbf16> to vector<128x128xbf16>
    %cst_50 = arith.constant dense<0.000000e+00> : vector<16x128xf32>
    %77 = tpu.matmul %74, %76, %cst_50 {dimension_numbers = #tpu.dot_dimension_numbers<[1], [0], [0], [1], [0, 0, 1, 1], [], []>} : vector<16x128xbf16>, vector<128x128xbf16>, vector<16x128xf32> -> vector<16x128xf32>
    %78 = arith.addf %73, %77 : vector<16x128xf32>
    %79 = vector.extract_strided_slice %12 {offsets = [208, 0], sizes = [16, 128], strides = [1, 1]} : vector<256x128xbf16> to vector<16x128xbf16>
    %c13 = arith.constant 13 : index
    %c0_51 = arith.constant 0 : index
    %c0_52 = arith.constant 0 : index
    %80 = vector.load %arg5[%c13, %c0_51, %c0_52] : memref<16x128x128xbf16, #tpu.memory_space<vmem>>, vector<1x128x128xbf16>
    %81 = vector.shape_cast %80 : vector<1x128x128xbf16> to vector<128x128xbf16>
    %cst_53 = arith.constant dense<0.000000e+00> : vector<16x128xf32>
    %82 = tpu.matmul %79, %81, %cst_53 {dimension_numbers = #tpu.dot_dimension_numbers<[1], [0], [0], [1], [0, 0, 1, 1], [], []>} : vector<16x128xbf16>, vector<128x128xbf16>, vector<16x128xf32> -> vector<16x128xf32>
    %83 = arith.addf %78, %82 : vector<16x128xf32>
    %84 = vector.extract_strided_slice %12 {offsets = [224, 0], sizes = [16, 128], strides = [1, 1]} : vector<256x128xbf16> to vector<16x128xbf16>
    %c14 = arith.constant 14 : index
    %c0_54 = arith.constant 0 : index
    %c0_55 = arith.constant 0 : index
    %85 = vector.load %arg5[%c14, %c0_54, %c0_55] : memref<16x128x128xbf16, #tpu.memory_space<vmem>>, vector<1x128x128xbf16>
    %86 = vector.shape_cast %85 : vector<1x128x128xbf16> to vector<128x128xbf16>
    %cst_56 = arith.constant dense<0.000000e+00> : vector<16x128xf32>
    %87 = tpu.matmul %84, %86, %cst_56 {dimension_numbers = #tpu.dot_dimension_numbers<[1], [0], [0], [1], [0, 0, 1, 1], [], []>} : vector<16x128xbf16>, vector<128x128xbf16>, vector<16x128xf32> -> vector<16x128xf32>
    %88 = arith.addf %83, %87 : vector<16x128xf32>
    %89 = vector.extract_strided_slice %12 {offsets = [240, 0], sizes = [16, 128], strides = [1, 1]} : vector<256x128xbf16> to vector<16x128xbf16>
    %c15 = arith.constant 15 : index
    %c0_57 = arith.constant 0 : index
    %c0_58 = arith.constant 0 : index
    %90 = vector.load %arg5[%c15, %c0_57, %c0_58] : memref<16x128x128xbf16, #tpu.memory_space<vmem>>, vector<1x128x128xbf16>
    %91 = vector.shape_cast %90 : vector<1x128x128xbf16> to vector<128x128xbf16>
    %cst_59 = arith.constant dense<0.000000e+00> : vector<16x128xf32>
    %92 = tpu.matmul %89, %91, %cst_59 {dimension_numbers = #tpu.dot_dimension_numbers<[1], [0], [0], [1], [0, 0, 1, 1], [], []>} : vector<16x128xbf16>, vector<128x128xbf16>, vector<16x128xf32> -> vector<16x128xf32>
    %93 = arith.addf %88, %92 : vector<16x128xf32>
    %c0_60 = arith.constant 0 : index
    %c0_61 = arith.constant 0 : index
    %94 = vector.load %arg6[%c0_60, %c0_61] : memref<1x128xf32, #tpu.memory_space<vmem>>, vector<1x128xf32>
    %95 = vector.broadcast %94 : vector<1x128xf32> to vector<16x128xf32>
    %96 = arith.addf %93, %95 : vector<16x128xf32>
    %cst_62 = arith.constant 0.000000e+00 : f32
    %97 = vector.broadcast %cst_62 : f32 to vector<16x128xf32>
    %98 = arith.maximumf %96, %97 : vector<16x128xf32>
    %99 = arith.truncf %98 : vector<16x128xf32> to vector<16x128xbf16>
    %c0_63 = arith.constant 0 : index
    %c0_64 = arith.constant 0 : index
    %100 = vector.load %arg7[%c0_63, %c0_64] : memref<36x16xbf16, #tpu.memory_space<vmem>>, vector<36x16xbf16>
    %cst_65 = arith.constant dense<0.000000e+00> : vector<36x128xf32>
    %101 = tpu.matmul %100, %99, %cst_65 {dimension_numbers = #tpu.dot_dimension_numbers<[1], [0], [0], [1], [0, 0, 1, 1], [], []>} : vector<36x16xbf16>, vector<16x128xbf16>, vector<36x128xf32> -> vector<36x128xf32>
    %102 = arith.truncf %101 : vector<36x128xf32> to vector<36x128xbf16>
    %cst_66 = arith.constant 0.000000e+00 : f32
    %103 = vector.broadcast %cst_66 : f32 to vector<4x128xf32>
    %104 = vector.extract_strided_slice %102 {offsets = [0, 0], sizes = [4, 128], strides = [1, 1]} : vector<36x128xbf16> to vector<4x128xbf16>
    %c0_67 = arith.constant 0 : index
    %c0_68 = arith.constant 0 : index
    %c0_69 = arith.constant 0 : index
    %105 = vector.load %arg8[%c0_67, %c0_68, %c0_69] : memref<9x128x128xbf16, #tpu.memory_space<vmem>>, vector<1x128x128xbf16>
    %106 = vector.shape_cast %105 : vector<1x128x128xbf16> to vector<128x128xbf16>
    %cst_70 = arith.constant dense<0.000000e+00> : vector<4x128xf32>
    %107 = tpu.matmul %104, %106, %cst_70 {dimension_numbers = #tpu.dot_dimension_numbers<[1], [0], [0], [1], [0, 0, 1, 1], [], []>} : vector<4x128xbf16>, vector<128x128xbf16>, vector<4x128xf32> -> vector<4x128xf32>
    %108 = arith.addf %103, %107 : vector<4x128xf32>
    %109 = vector.extract_strided_slice %102 {offsets = [4, 0], sizes = [4, 128], strides = [1, 1]} : vector<36x128xbf16> to vector<4x128xbf16>
    %c1_71 = arith.constant 1 : index
    %c0_72 = arith.constant 0 : index
    %c0_73 = arith.constant 0 : index
    %110 = vector.load %arg8[%c1_71, %c0_72, %c0_73] : memref<9x128x128xbf16, #tpu.memory_space<vmem>>, vector<1x128x128xbf16>
    %111 = vector.shape_cast %110 : vector<1x128x128xbf16> to vector<128x128xbf16>
    %cst_74 = arith.constant dense<0.000000e+00> : vector<4x128xf32>
    %112 = tpu.matmul %109, %111, %cst_74 {dimension_numbers = #tpu.dot_dimension_numbers<[1], [0], [0], [1], [0, 0, 1, 1], [], []>} : vector<4x128xbf16>, vector<128x128xbf16>, vector<4x128xf32> -> vector<4x128xf32>
    %113 = arith.addf %108, %112 : vector<4x128xf32>
    %114 = vector.extract_strided_slice %102 {offsets = [8, 0], sizes = [4, 128], strides = [1, 1]} : vector<36x128xbf16> to vector<4x128xbf16>
    %c2_75 = arith.constant 2 : index
    %c0_76 = arith.constant 0 : index
    %c0_77 = arith.constant 0 : index
    %115 = vector.load %arg8[%c2_75, %c0_76, %c0_77] : memref<9x128x128xbf16, #tpu.memory_space<vmem>>, vector<1x128x128xbf16>
    %116 = vector.shape_cast %115 : vector<1x128x128xbf16> to vector<128x128xbf16>
    %cst_78 = arith.constant dense<0.000000e+00> : vector<4x128xf32>
    %117 = tpu.matmul %114, %116, %cst_78 {dimension_numbers = #tpu.dot_dimension_numbers<[1], [0], [0], [1], [0, 0, 1, 1], [], []>} : vector<4x128xbf16>, vector<128x128xbf16>, vector<4x128xf32> -> vector<4x128xf32>
    %118 = arith.addf %113, %117 : vector<4x128xf32>
    %119 = vector.extract_strided_slice %102 {offsets = [12, 0], sizes = [4, 128], strides = [1, 1]} : vector<36x128xbf16> to vector<4x128xbf16>
    %c3_79 = arith.constant 3 : index
    %c0_80 = arith.constant 0 : index
    %c0_81 = arith.constant 0 : index
    %120 = vector.load %arg8[%c3_79, %c0_80, %c0_81] : memref<9x128x128xbf16, #tpu.memory_space<vmem>>, vector<1x128x128xbf16>
    %121 = vector.shape_cast %120 : vector<1x128x128xbf16> to vector<128x128xbf16>
    %cst_82 = arith.constant dense<0.000000e+00> : vector<4x128xf32>
    %122 = tpu.matmul %119, %121, %cst_82 {dimension_numbers = #tpu.dot_dimension_numbers<[1], [0], [0], [1], [0, 0, 1, 1], [], []>} : vector<4x128xbf16>, vector<128x128xbf16>, vector<4x128xf32> -> vector<4x128xf32>
    %123 = arith.addf %118, %122 : vector<4x128xf32>
    %124 = vector.extract_strided_slice %102 {offsets = [16, 0], sizes = [4, 128], strides = [1, 1]} : vector<36x128xbf16> to vector<4x128xbf16>
    %c4_83 = arith.constant 4 : index
    %c0_84 = arith.constant 0 : index
    %c0_85 = arith.constant 0 : index
    %125 = vector.load %arg8[%c4_83, %c0_84, %c0_85] : memref<9x128x128xbf16, #tpu.memory_space<vmem>>, vector<1x128x128xbf16>
    %126 = vector.shape_cast %125 : vector<1x128x128xbf16> to vector<128x128xbf16>
    %cst_86 = arith.constant dense<0.000000e+00> : vector<4x128xf32>
    %127 = tpu.matmul %124, %126, %cst_86 {dimension_numbers = #tpu.dot_dimension_numbers<[1], [0], [0], [1], [0, 0, 1, 1], [], []>} : vector<4x128xbf16>, vector<128x128xbf16>, vector<4x128xf32> -> vector<4x128xf32>
    %128 = arith.addf %123, %127 : vector<4x128xf32>
    %129 = vector.extract_strided_slice %102 {offsets = [20, 0], sizes = [4, 128], strides = [1, 1]} : vector<36x128xbf16> to vector<4x128xbf16>
    %c5_87 = arith.constant 5 : index
    %c0_88 = arith.constant 0 : index
    %c0_89 = arith.constant 0 : index
    %130 = vector.load %arg8[%c5_87, %c0_88, %c0_89] : memref<9x128x128xbf16, #tpu.memory_space<vmem>>, vector<1x128x128xbf16>
    %131 = vector.shape_cast %130 : vector<1x128x128xbf16> to vector<128x128xbf16>
    %cst_90 = arith.constant dense<0.000000e+00> : vector<4x128xf32>
    %132 = tpu.matmul %129, %131, %cst_90 {dimension_numbers = #tpu.dot_dimension_numbers<[1], [0], [0], [1], [0, 0, 1, 1], [], []>} : vector<4x128xbf16>, vector<128x128xbf16>, vector<4x128xf32> -> vector<4x128xf32>
    %133 = arith.addf %128, %132 : vector<4x128xf32>
    %134 = vector.extract_strided_slice %102 {offsets = [24, 0], sizes = [4, 128], strides = [1, 1]} : vector<36x128xbf16> to vector<4x128xbf16>
    %c6_91 = arith.constant 6 : index
    %c0_92 = arith.constant 0 : index
    %c0_93 = arith.constant 0 : index
    %135 = vector.load %arg8[%c6_91, %c0_92, %c0_93] : memref<9x128x128xbf16, #tpu.memory_space<vmem>>, vector<1x128x128xbf16>
    %136 = vector.shape_cast %135 : vector<1x128x128xbf16> to vector<128x128xbf16>
    %cst_94 = arith.constant dense<0.000000e+00> : vector<4x128xf32>
    %137 = tpu.matmul %134, %136, %cst_94 {dimension_numbers = #tpu.dot_dimension_numbers<[1], [0], [0], [1], [0, 0, 1, 1], [], []>} : vector<4x128xbf16>, vector<128x128xbf16>, vector<4x128xf32> -> vector<4x128xf32>
    %138 = arith.addf %133, %137 : vector<4x128xf32>
    %139 = vector.extract_strided_slice %102 {offsets = [28, 0], sizes = [4, 128], strides = [1, 1]} : vector<36x128xbf16> to vector<4x128xbf16>
    %c7_95 = arith.constant 7 : index
    %c0_96 = arith.constant 0 : index
    %c0_97 = arith.constant 0 : index
    %140 = vector.load %arg8[%c7_95, %c0_96, %c0_97] : memref<9x128x128xbf16, #tpu.memory_space<vmem>>, vector<1x128x128xbf16>
    %141 = vector.shape_cast %140 : vector<1x128x128xbf16> to vector<128x128xbf16>
    %cst_98 = arith.constant dense<0.000000e+00> : vector<4x128xf32>
    %142 = tpu.matmul %139, %141, %cst_98 {dimension_numbers = #tpu.dot_dimension_numbers<[1], [0], [0], [1], [0, 0, 1, 1], [], []>} : vector<4x128xbf16>, vector<128x128xbf16>, vector<4x128xf32> -> vector<4x128xf32>
    %143 = arith.addf %138, %142 : vector<4x128xf32>
    %144 = vector.extract_strided_slice %102 {offsets = [32, 0], sizes = [4, 128], strides = [1, 1]} : vector<36x128xbf16> to vector<4x128xbf16>
    %c8_99 = arith.constant 8 : index
    %c0_100 = arith.constant 0 : index
    %c0_101 = arith.constant 0 : index
    %145 = vector.load %arg8[%c8_99, %c0_100, %c0_101] : memref<9x128x128xbf16, #tpu.memory_space<vmem>>, vector<1x128x128xbf16>
    %146 = vector.shape_cast %145 : vector<1x128x128xbf16> to vector<128x128xbf16>
    %cst_102 = arith.constant dense<0.000000e+00> : vector<4x128xf32>
    %147 = tpu.matmul %144, %146, %cst_102 {dimension_numbers = #tpu.dot_dimension_numbers<[1], [0], [0], [1], [0, 0, 1, 1], [], []>} : vector<4x128xbf16>, vector<128x128xbf16>, vector<4x128xf32> -> vector<4x128xf32>
    %148 = arith.addf %143, %147 : vector<4x128xf32>
    %c0_103 = arith.constant 0 : index
    %c0_104 = arith.constant 0 : index
    %149 = vector.load %arg9[%c0_103, %c0_104] : memref<1x128xf32, #tpu.memory_space<vmem>>, vector<1x128xf32>
    %150 = vector.broadcast %149 : vector<1x128xf32> to vector<4x128xf32>
    %151 = arith.addf %148, %150 : vector<4x128xf32>
    %cst_105 = arith.constant 0.000000e+00 : f32
    %152 = vector.broadcast %cst_105 : f32 to vector<4x128xf32>
    %153 = arith.maximumf %151, %152 : vector<4x128xf32>
    %154 = arith.truncf %153 : vector<4x128xf32> to vector<4x128xbf16>
    %cst_106 = arith.constant 0.000000e+00 : f32
    %155 = vector.broadcast %cst_106 : f32 to vector<1x128xf32>
    %156 = vector.extract_strided_slice %154 {offsets = [0, 0], sizes = [1, 128], strides = [1, 1]} : vector<4x128xbf16> to vector<1x128xbf16>
    %c0_107 = arith.constant 0 : index
    %c0_108 = arith.constant 0 : index
    %c0_109 = arith.constant 0 : index
    %157 = vector.load %arg10[%c0_107, %c0_108, %c0_109] : memref<4x128x128xbf16, #tpu.memory_space<vmem>>, vector<1x128x128xbf16>
    %158 = vector.shape_cast %157 : vector<1x128x128xbf16> to vector<128x128xbf16>
    %cst_110 = arith.constant dense<0.000000e+00> : vector<1x128xf32>
    %159 = tpu.matmul %156, %158, %cst_110 {dimension_numbers = #tpu.dot_dimension_numbers<[1], [0], [0], [1], [0, 0, 1, 1], [], []>} : vector<1x128xbf16>, vector<128x128xbf16>, vector<1x128xf32> -> vector<1x128xf32>
    %160 = arith.addf %155, %159 : vector<1x128xf32>
    %161 = vector.extract_strided_slice %154 {offsets = [1, 0], sizes = [1, 128], strides = [1, 1]} : vector<4x128xbf16> to vector<1x128xbf16>
    %c1_111 = arith.constant 1 : index
    %c0_112 = arith.constant 0 : index
    %c0_113 = arith.constant 0 : index
    %162 = vector.load %arg10[%c1_111, %c0_112, %c0_113] : memref<4x128x128xbf16, #tpu.memory_space<vmem>>, vector<1x128x128xbf16>
    %163 = vector.shape_cast %162 : vector<1x128x128xbf16> to vector<128x128xbf16>
    %cst_114 = arith.constant dense<0.000000e+00> : vector<1x128xf32>
    %164 = tpu.matmul %161, %163, %cst_114 {dimension_numbers = #tpu.dot_dimension_numbers<[1], [0], [0], [1], [0, 0, 1, 1], [], []>} : vector<1x128xbf16>, vector<128x128xbf16>, vector<1x128xf32> -> vector<1x128xf32>
    %165 = arith.addf %160, %164 : vector<1x128xf32>
    %166 = vector.extract_strided_slice %154 {offsets = [2, 0], sizes = [1, 128], strides = [1, 1]} : vector<4x128xbf16> to vector<1x128xbf16>
    %c2_115 = arith.constant 2 : index
    %c0_116 = arith.constant 0 : index
    %c0_117 = arith.constant 0 : index
    %167 = vector.load %arg10[%c2_115, %c0_116, %c0_117] : memref<4x128x128xbf16, #tpu.memory_space<vmem>>, vector<1x128x128xbf16>
    %168 = vector.shape_cast %167 : vector<1x128x128xbf16> to vector<128x128xbf16>
    %cst_118 = arith.constant dense<0.000000e+00> : vector<1x128xf32>
    %169 = tpu.matmul %166, %168, %cst_118 {dimension_numbers = #tpu.dot_dimension_numbers<[1], [0], [0], [1], [0, 0, 1, 1], [], []>} : vector<1x128xbf16>, vector<128x128xbf16>, vector<1x128xf32> -> vector<1x128xf32>
    %170 = arith.addf %165, %169 : vector<1x128xf32>
    %171 = vector.extract_strided_slice %154 {offsets = [3, 0], sizes = [1, 128], strides = [1, 1]} : vector<4x128xbf16> to vector<1x128xbf16>
    %c3_119 = arith.constant 3 : index
    %c0_120 = arith.constant 0 : index
    %c0_121 = arith.constant 0 : index
    %172 = vector.load %arg10[%c3_119, %c0_120, %c0_121] : memref<4x128x128xbf16, #tpu.memory_space<vmem>>, vector<1x128x128xbf16>
    %173 = vector.shape_cast %172 : vector<1x128x128xbf16> to vector<128x128xbf16>
    %cst_122 = arith.constant dense<0.000000e+00> : vector<1x128xf32>
    %174 = tpu.matmul %171, %173, %cst_122 {dimension_numbers = #tpu.dot_dimension_numbers<[1], [0], [0], [1], [0, 0, 1, 1], [], []>} : vector<1x128xbf16>, vector<128x128xbf16>, vector<1x128xf32> -> vector<1x128xf32>
    %175 = arith.addf %170, %174 : vector<1x128xf32>
    %c0_123 = arith.constant 0 : index
    %c0_124 = arith.constant 0 : index
    %176 = vector.load %arg11[%c0_123, %c0_124] : memref<1x128xf32, #tpu.memory_space<vmem>>, vector<1x128xf32>
    %177 = arith.addf %175, %176 : vector<1x128xf32>
    %cst_125 = arith.constant 0.000000e+00 : f32
    %178 = vector.broadcast %cst_125 : f32 to vector<1x128xf32>
    %179 = arith.maximumf %177, %178 : vector<1x128xf32>
    %c0_126 = arith.constant 0 : index
    %c0_127 = arith.constant 0 : index
    %c0_128 = arith.constant 0 : index
    %180 = vector.load %arg12[%c0_126, %c0_127, %c0_128] : memref<1x1x128xf32, #tpu.memory_space<vmem>>, vector<1x1x128xf32>
    %181 = vector.shape_cast %180 : vector<1x1x128xf32> to vector<1x128xf32>
    %182 = vector.shape_cast %179 : vector<1x128xf32> to vector<1x1x128xf32>
    tpu.vector_store %arg12[%c0_126, %c0_127, %c0_128], %182 {strides = array<i32>} : memref<1x1x128xf32, #tpu.memory_space<vmem>>, vector<1x1x128xf32>,
    return
  }
  func.func @transform_0(%arg0: i32) -> (i32, i32, i32) {
    %c0_i32 = arith.constant 0 : i32
    %c0_i32_0 = arith.constant 0 : i32
    %c0_i32_1 = arith.constant 0 : i32
    return %arg0, %c0_i32, %c0_i32_0 : i32, i32, i32
  }
  func.func @transform_1(%arg0: i32) -> (i32, i32) {
    %c0_i32 = arith.constant 0 : i32
    %c0_i32_0 = arith.constant 0 : i32
    %c0_i32_1 = arith.constant 0 : i32
    return %c0_i32, %c0_i32_0 : i32, i32
  }
  func.func @transform_2(%arg0: i32) -> (i32, i32) {
    %c0_i32 = arith.constant 0 : i32
    %c0_i32_0 = arith.constant 0 : i32
    %c0_i32_1 = arith.constant 0 : i32
    return %c0_i32, %c0_i32_0 : i32, i32
  }
  func.func @transform_3(%arg0: i32) -> (i32, i32) {
    %c0_i32 = arith.constant 0 : i32
    %c0_i32_0 = arith.constant 0 : i32
    %c0_i32_1 = arith.constant 0 : i32
    return %c0_i32, %c0_i32_0 : i32, i32
  }
  func.func @transform_4(%arg0: i32) -> (i32, i32, i32) {
    %c0_i32 = arith.constant 0 : i32
    %c0_i32_0 = arith.constant 0 : i32
    %c0_i32_1 = arith.constant 0 : i32
    %c0_i32_2 = arith.constant 0 : i32
    return %c0_i32, %c0_i32_0, %c0_i32_1 : i32, i32, i32
  }
  func.func @transform_5(%arg0: i32) -> (i32, i32) {
    %c0_i32 = arith.constant 0 : i32
    %c0_i32_0 = arith.constant 0 : i32
    %c0_i32_1 = arith.constant 0 : i32
    return %c0_i32, %c0_i32_0 : i32, i32
  }
  func.func @transform_6(%arg0: i32) -> (i32, i32) {
    %c0_i32 = arith.constant 0 : i32
    %c0_i32_0 = arith.constant 0 : i32
    %c0_i32_1 = arith.constant 0 : i32
    return %c0_i32, %c0_i32_0 : i32, i32
  }
  func.func @transform_7(%arg0: i32) -> (i32, i32, i32) {
    %c0_i32 = arith.constant 0 : i32
    %c0_i32_0 = arith.constant 0 : i32
    %c0_i32_1 = arith.constant 0 : i32
    %c0_i32_2 = arith.constant 0 : i32
    return %c0_i32, %c0_i32_0, %c0_i32_1 : i32, i32, i32
  }
  func.func @transform_8(%arg0: i32) -> (i32, i32) {
    %c0_i32 = arith.constant 0 : i32
    %c0_i32_0 = arith.constant 0 : i32
    %c0_i32_1 = arith.constant 0 : i32
    return %c0_i32, %c0_i32_0 : i32, i32
  }
  func.func @transform_9(%arg0: i32) -> (i32, i32, i32) {
    %c0_i32 = arith.constant 0 : i32
    %c0_i32_0 = arith.constant 0 : i32
    %c0_i32_1 = arith.constant 0 : i32
    %c0_i32_2 = arith.constant 0 : i32
    return %c0_i32, %c0_i32_0, %c0_i32_1 : i32, i32, i32
  }
  func.func @transform_10(%arg0: i32) -> (i32, i32) {
    %c0_i32 = arith.constant 0 : i32
    %c0_i32_0 = arith.constant 0 : i32
    %c0_i32_1 = arith.constant 0 : i32
    return %c0_i32, %c0_i32_0 : i32, i32
  }
  func.func @transform_11(%arg0: i32) -> (i32, i32, i32) {
    %c0_i32 = arith.constant 0 : i32
    %c0_i32_0 = arith.constant 0 : i32
    %c0_i32_1 = arith.constant 0 : i32
    return %arg0, %c0_i32, %c0_i32_0 : i32, i32, i32
  }
}

</mosaic_0001>

<bundles_post_ra>
// kernel: actor_cnn_emb_forward.1
= control target key start
LH: loop header
LB: loop body
LE: loop exit
PB: predicated region body
PF: predicated region fallthrough
CT: control target
= control target key end

     0   :  { %16 = vsyncpa [#allocation3], 0  ;;  %s7807_s0 = inlined_call_operand.vmem [shape: bf16[2,100,256], index: 0, kind: input, shape index: {}]   ;;  %s7808_s1 = inlined_call_operand.vmem [shape: bf16[256,128], index: 1, kind: input, shape index: {}]   ;;  %s7809_s2 = inlined_call_operand.vmem [shape: f32[1,128], index: 2, kind: input, shape index: {}]   ;;  %s7810_s3 = inlined_call_operand.vmem [shape: bf16[256,100], index: 3, kind: input, shape index: {}]   ;;  %s7811_s4 = inlined_call_operand.vmem [shape: bf16[16,128,128], index: 4, kind: input, shape index: {}]   ;;  %s7812_s5 = inlined_call_operand.vmem [shape: f32[1,128], index: 5, kind: input, shape index: {}]   ;;  %s7813_s6 = inlined_call_operand.vmem [shape: bf16[36,16], index: 6, kind: input, shape index: {}]   ;;  %s7814_s7 = inlined_call_operand.vmem [shape: bf16[9,128,128], index: 7, kind: input, shape index: {}]   ;;  %s7815_s8 = inlined_call_operand.vmem [shape: f32[1,128], index: 8, kind: input, shape index: {}]   ;;  %s7816_s9 = inlined_call_operand.vmem [shape: bf16[4,128,128], index: 9, kind: input, shape index: {}]   ;;  %s7817_s10 = inlined_call_operand.vmem [shape: f32[1,128], index: 10, kind: input, shape index: {}]   ;;  %s7818_s11 = inlined_call_operand.hbm [shape: f32[2,1,128], index: 11, kind: output, shape index: {}]  }
   0x1   :  { %18 = vsyncpa [#allocation3 + $0x1], 0  ;;  %s6517_s17 = smov 0   ;;  %s6519_s18 = smov 0  }
   0x2   :  { %s6521_s19 = smov 0   ;;  %s6523_s20 = smov 0  }
   0x3 LB: > { %7820 = sst [smem:[#allocation5_spill]] %s6448_s19  ;;  %s6538_s21 = sadd.s32 4294967295, %s6452_s20   ;;  %s6452_s20 = sphi %s6523_s20, %s7828_s20   ;;  %s6448_s19 = sphi %s6521_s19, %s7825_s19   ;;  %s6444_s18 = sphi %s6519_s18, %s7827_s18   ;;  %s6440_s17 = sphi %s6517_s17, %s7826_s17  }
   0x4   : > { %s4349_s22 = sadd.s32 4294967294, %s6452_s20   ;;  %s6542_s23 = sadd.s32 1, %s6452_s20  }
   0x5   : > { %s267_s24 = sadd.s32 1, %s6448_s19  ;;  %s264_s25 = ssub.s32 %s6452_s20, %s6542_s23 }
   0x6   : > { %p277_p0 = scmp.ne.s32.totalorder %s6448_s19, %s6444_s18  ;;  %p265_p1 = scmp.eq.s32.totalorder %s264_s25, 0 }
   0x7   : > { %p278_p2 = scmp.eq.s32.totalorder %s6538_s21, 1  ;;  %p283_p3 = scmp.ne.s32.totalorder %s6444_s18, %s6440_s17 }
   0x8   : > { %p284_p4 = scmp.eq.s32.totalorder %s4349_s22, 1  ;;  %p4352_p7 = scmp.ge.s32.totalorder %s6452_s20, 1 }
   0x9   : > { %s6553_s26 = scalar_select %p265_p1, %s6448_s19, %s267_s24  }
   0xa   : > { %p6555_p5 = por %p278_p2, %p277_p0  ;;  %p6559_p6 = por %p284_p4, %p283_p3 }
   0xb   : > { %7821 = sst [smem:[#allocation6_spill]] %s6553_s26  ;;  %p340_p8 = scmp.lt.s32.totalorder %s6452_s20, 3 }
   0xd   : > { %p341_p9 = pnand %p4352_p7, %p340_p8 }
   0xe   : > { %p379_p10 = scmp.lt.s32.totalorder (!%p341_p9), %s6538_s21, 1  ;;  %s5073_s24 = sshll.u32 (!%p341_p9), %s6538_s21, 4 }
   0xf   : > { %344 = sbr.rel (%p341_p9) target bundleno = 1743 (0x6cf), region = 64  ;;  %s4292_s14 = scalar_lea.hbm (!%p341_p9), %s7818_s11, %s5073_s24 }
  0x10   : > { %s6456_s19 = smov (!%p341_p9), [#allocation2]  }
  0x11   : > { %s6396_s26 = sshll.u32 (!%p341_p9), %s6456_s19, 4  ;;  %s6397_s26 = int_to_ptr.vmem [resolvable:$false] %s6396_s26 }
  0x14   : > { %v6105_v0 = vld [vmem:[%s7808_s1 + $0x78] sm:$0xff]   ;;  %v6107_v2 = vld [vmem:[%s7808_s1 + $0x70] sm:$0xff]   ;;  %v6109_v4 = vld [vmem:[%s7808_s1 + $0x68] sm:$0xff]   ;;  %s380_s29 = scalar_select %p379_p10, %s6538_s21, 1  ;;  %vm820_vm0 = vcmask 818176   ;;  %v6454_v33 = vmov 0.0  }
  0x15   : > { %v6106_v1 = vld [vmem:[%s7808_s1 + $0x38] sm:$0xff]   ;;  %5076 = vmatprep.subr.bf16.mxu0 %v6105_v0  ;;  %v6108_v3 = vld [vmem:[%s7808_s1 + $0x30] sm:$0xff]   ;;  %v6110_v5 = vld [vmem:[%s7808_s1 + $0x28] sm:$0xff]   ;;  %vm869_vm1 = vcmask 1041408   ;;  %vm6455_vm2 = vmmov 0   ;;  %vm2803_vm3 = vcmask 130048  }
  0x16   : > { %5077 = vmatpush3.bf16.msra.mxu0 %v6106_v1  ;;  %v6111_v6 = vld [vmem:[%s7808_s1 + $0x60] sm:$0xff]   ;;  %s6063_s15 = smul.u32 104, %s380_s29  ;;  %v6113_v8 = vld [vmem:[%s7808_s1 + $0x58] sm:$0xff]   ;;  %v6115_v10 = vld [vmem:[%s7808_s1 + $0x50] sm:$0xff]   ;;  %s6398_s21 = scalar_lea.vmem %s6397_s26, 32 }
  0x17   : > { %5078 = vmatprep.subr.bf16.mxu0 %v6107_v2  ;;  %v6112_v7 = vld [vmem:[%s7808_s1 + $0x20] sm:$0xff]   ;;  %v6114_v9 = vld [vmem:[%s7808_s1 + $0x18] sm:$0xff]   ;;  %v6116_v12 = vld [vmem:[%s7808_s1 + $0x10] sm:$0xff]  }
  0x18   : > { %s6597_s30 = scalar_lea.vmem %s7807_s0, %s6063_s15  ;;  %v6117_v13 = vld [vmem:[%s7808_s1 + $0x48] sm:$0xff]   ;;  %v6119_v15 = vld [vmem:[%s7808_s1 + $0x40] sm:$0xff]   ;;  %v6152_v32 = vld [vmem:[%s7811_s4 + $0x78] sm:$0xff]  }
  0x19   : > { %v6123_v11 = vld [vmem:[%s6597_s30 + $0x4] ss:$8 sps:$4 sm:$0xff]   ;;  %v6121_v17 = vld [vmem:[%s6597_s30] ss:$8 sps:$4 sm:$0xff]   ;;  %v6124_v18 = vld [vmem:[%s6597_s30 + $0x14] ss:$8 sps:$4 sm:$0xff]  }
  0x1a   : > { %5079 = vmatpush3.bf16.msra.mxu0 %v6108_v3  ;;  %632 = vmatprep.mubr.bf16.mxu0 %v6123_v11  ;;  %v6118_v14 = vld [vmem:[%s7808_s1 + $0x8] sm:$0xff]   ;;  %v6120_v16 = vld [vmem:[%s7808_s1] sm:$0xff]   ;;  %v6126_v19 = vld [vmem:[%s6597_s30 + $0x10] ss:$8 sps:$4 sm:$0xff]  }
  0x1b   : > { %5080 = vmatprep.subr.bf16.mxu0 %v6109_v4  ;;  %v6127_v20 = vld [vmem:[%s6597_s30 + $0x24] ss:$8 sps:$4 sm:$0xff]   ;;  %v6129_v21 = vld [vmem:[%s6597_s30 + $0x20] ss:$8 sps:$4 sm:$0xff]   ;;  %v6130_v22 = vld [vmem:[%s6597_s30 + $0x34] ss:$8 sps:$4 sm:$0xff]  }
  0x1c   : > { %v6132_v23 = vld [vmem:[%s6597_s30 + $0x30] ss:$8 sps:$4 sm:$0xff]   ;;  %v6133_v24 = vld [vmem:[%s6597_s30 + $0x44] ss:$8 sps:$4 sm:$0xff]   ;;  %v6135_v25 = vld [vmem:[%s6597_s30 + $0x40] ss:$8 sps:$4 sm:$0xff]  }
  0x1d   : > { %v6136_v26 = vld [vmem:[%s6597_s30 + $0x54] ss:$8 sps:$4 sm:$0xff]   ;;  %v397_v27 = vld [vmem:[%s6597_s30 + $0x60] sm:$0x33]  ;;  %v6138_v28 = vld [vmem:[%s6597_s30 + $0x50] ss:$8 sps:$4 sm:$0xff]  }
  0x1e   : > { %5081 = vmatpush3.bf16.msra.mxu0 %v6110_v5  ;;  %v4368_v29 = vcombine.high %v397_v27, %v397_v27  ;;  %v4367_v30 = vcombine.low %v397_v27, %v397_v27  ;;  %v6141_v31 = vld [vmem:[%s7810_s3] sm:$0xff]   ;;  %v6156_v34 = vld [vmem:[%s7811_s4 + $0x70] sm:$0xff]   ;;  %v6158_v36 = vld [vmem:[%s7811_s4 + $0x68] sm:$0xff]   ;;  %s377_s30 = sand.u32 1, %s6444_s18  }
  0x1f   : > { %5082 = vmatprep.subr.bf16.mxu0 %v6111_v6  ;;  %5436 = vmatprep.mubr.msk.bf16.mxu1 %vm820_vm0, %v6141_v31  ;;  %v6652_v39 = vld [vmem:[%s7809_s2] ss:$0 sm:$0xff]  ;;  %v6162_v47 = vld [vmem:[%s7811_s4 + $0x58] sm:$0xff]   ;;  %v6166_v53 = vld [vmem:[%s7811_s4 + $0x50] sm:$0xff]   ;;  %s378_s25 = scalar_lea.vmem [#allocation2], %s377_s30  ;;  %s4282_s16 = scalar_lea.sflag [#allocation3], %s377_s30 }
  0x20   : > { %v6160_v41 = vld [vmem:[%s7811_s4 + $0x60] sm:$0xff]   ;;  %v6169_v56 = vld [vmem:[%s7811_s4 + $0x48] sm:$0xff]   ;;  %s4294_s12 = sshll.u32 %s378_s25, 4  ;;  %s4295_s12 = int_to_ptr.vmem [resolvable:$true] %s4294_s12 }
  0x21   : > { %s6392_s22 = scalar_lea.vmem %s4295_s12, 16  ;;  %p6399_p0 = scmp.lt.s32.totalorder %s4295_s12, %s6397_s26 }
  0x22   : > { %5083 = vmatpush3.bf16.msra.mxu0 %v6112_v7  ;;  %p6393_p11 = scmp.ne.s32.totalorder %s4295_s12, %s6392_s22  ;;  %p6400_p1 = scmp.lt.s32.totalorder %s6398_s21, %s6392_s22 }
  0x23   : > { %5084 = vmatprep.subr.bf16.mxu0 %v6113_v8 }
  0x24   : > { %p6394_p12 = pnand %p6393_p11, %p6555_p5  ;;  %p6401_p2 = por %p6400_p1, %p6399_p0 }
  0x26   : > { %5085 = vmatpush3.bf16.msra.mxu0 %v6114_v9  ;;  %p6395_p13 = pneg %p6394_p12 }
  0x27   : > { %5086 = vmatprep.subr.bf16.mxu0 %v6115_v10 }
  0x28   : > { %p6402_p3 = pnand %p6401_p2, %p6395_p13 }
  0x2a   : > { %5087 = vmatpush3.bf16.msra.mxu0 %v6116_v12 }
  0x2b   : > { %5088 = vmatprep.subr.bf16.mxu0 %v6117_v13 }
  0x2e   : > { %5089 = vmatpush3.bf16.msra.mxu0 %v6118_v14 }
  0x2f   : > { %5090 = vmatprep.subr.bf16.mxu0 %v6119_v15 }
  0x32   : > { %5091 = vmatpush3.bf16.msra.mxu0 %v6120_v16 }
  0x33   : > { %5468 = vmatprep.subr.bf16.mxu0 %v6454_v33 }
  0x35   : > { %633 = vmatmul.mubr.bf16.vlgmr.msra.gmra.mxu0 %v6121_v17 }
  0x36   : > { %640 = vmatprep.mubr.bf16.mxu0 %v6124_v18  ;;  %5469 = vmatpush3.bf16.msra.mxu0 %v6152_v32 }
  0x37   : > { %5470 = vmatprep.subr.bf16.mxu0 %v6454_v33 }
  0x3a   : > { %5471 = vmatpush3.bf16.msra.mxu0 %v6156_v34 }
  0x3b   : > { %5472 = vmatprep.subr.bf16.mxu0 %v6454_v33 }
  0x3d   : > { %641 = vmatmul.mubr.bf16.gmra.mxu0 %v6126_v19 }
  0x3e   : > { %648 = vmatprep.mubr.bf16.mxu0 %v6127_v20  ;;  %5473 = vmatpush3.bf16.msra.mxu0 %v6158_v36 }
  0x3f   : > { %5474 = vmatprep.subr.bf16.mxu0 %v6454_v33 }
  0x42   : > { %5475 = vmatpush3.bf16.msra.mxu0 %v6160_v41 }
  0x43   : > { %5476 = vmatprep.subr.bf16.mxu0 %v6454_v33 }
  0x45   : > { %649 = vmatmul.mubr.bf16.gmra.mxu0 %v6129_v21 }
  0x46   : > { %656 = vmatprep.mubr.bf16.mxu0 %v6130_v22  ;;  %5477 = vmatpush3.bf16.msra.mxu0 %v6162_v47 }
  0x47   : > { %5478 = vmatprep.subr.bf16.mxu0 %v6454_v33 }
  0x4a   : > { %5479 = vmatpush3.bf16.msra.mxu0 %v6166_v53 }
  0x4b   : > { %5480 = vmatprep.subr.bf16.mxu0 %v6454_v33 }
  0x4d   : > { %657 = vmatmul.mubr.bf16.gmra.mxu0 %v6132_v23 }
  0x4e   : > { %664 = vmatprep.mubr.bf16.mxu0 %v6133_v24  ;;  %5481 = vmatpush3.bf16.msra.mxu0 %v6169_v56 }
  0x4f   : > { %5482 = vmatprep.subr.bf16.mxu0 %v6454_v33 }
  0x55   : > { %665 = vmatmul.mubr.bf16.gmra.mxu0 %v6135_v25 }
  0x56   : > { %672 = vmatprep.mubr.bf16.mxu0 %v6136_v26 }
  0x5d   : > { %673 = vmatmul.mubr.bf16.gmra.mxu0 %v6138_v28 }
  0x5e   : > { %680 = vmatprep.mubr.bf16.mxu0 %v4368_v29 }
  0x65   : > { %681 = vmatmul.mubr.bf16.gmra.mxu0 %v4367_v30 }
  0x66   : > { %5484 = vmatprep.mubr.msk.bf16.mxu0 %vm6455_vm2, %v6454_v33 }
  0xf5   : > { %v5092_v35 = vpop.f32.mrf.mxu0 }
  0xf7   : > { %v5093_v37 = vpop.f32.mrf.mxu0 }
  0xf8   : > { %v5094_v38 = vadd.f32 %v5093_v37, %v5092_v35 }
  0xf9   : > { %v5095_v40 = vpop.f32.mrf.mxu0 }
  0xfa   : > { %v635_v43 = vadd.f32 %v5094_v38, %v6652_v39 }
  0xfb   : > { %v5096_v42 = vpop.f32.mrf.mxu0 }
  0xfc   : > { %v5097_v44 = vadd.f32 %v5096_v42, %v5095_v40  ;;  %v688_v49 = vmax.f32 %v635_v43, 0.0 }
  0xfd   : > { %v6659_v45 = vpop.f32.mrf.mxu0 }
  0xfe   : > { %v638_v46 = vadd.f32 %v5097_v44, %v6652_v39 }
  0xff   : > { %v6665_v48 = vpop.f32.mrf.mxu0 }
 0x100   : > { %v689_v50 = vmax.f32 %v638_v46, 0.0  ;;  %v5100_v42 = vadd.f32 %v6665_v48, %v6659_v45  ;;  %v6142_v45 = vld [vmem:[%s7810_s3 + $0x8] sm:$0xff]   ;;  %v6151_v48 = vld [vmem:[%s7811_s4 + $0x38] sm:$0xff]  }
 0x101   : > { %v5101_v51 = vpop.f32.mrf.mxu0 }
 0x102   : > { %v6668_v52 = vpack.c.bf16 %v689_v50, %v688_v49  ;;  %v643_v50 = vadd.f32 %v5100_v42, %v6652_v39 }
 0x103   : > { %v5102_v54 = vpop.f32.mrf.mxu0 }
 0x104   : > { %v5103_v37 = vadd.f32 %v5102_v54, %v5101_v51 }
 0x105   : > { %v5104_v55 = vpop.f32.mrf.mxu0 }
 0x106   : > { %v646_v46 = vadd.f32 %v5103_v37, %v6652_v39  ;;  %v6187_v37 = vld [vmem:[%s7811_s4 + $0x80] sm:$0xff]  }
 0x107   : > { %v5105_v57 = vpop.f32.mrf.mxu0 }
 0x108   : > { %v5106_v34 = vadd.f32 %v5105_v57, %v5104_v55  ;;  %v691_v53 = vmax.f32 %v646_v46, 0.0  ;;  %v690_v55 = vmax.f32 %v643_v50, 0.0  ;;  %v6153_v57 = vld [vmem:[%s7811_s4 + $0x30] sm:$0xff]   ;;  %v6194_v50 = vld [vmem:[%s7811_s4 + $0x168] sm:$0xff]  }
 0x109   : > { %v5107_v58 = vpop.f32.mrf.mxu0  ;;  %v6191_v46 = vld [vmem:[%s7811_s4 + $0x130] sm:$0xff]  }
 0x10a   : > { %v651_v43 = vadd.f32 %v5106_v34, %v6652_v39  ;;  %v702_v56 = vpack.c.bf16 %v691_v53, %v690_v55  ;;  %v6185_v34 = vld [vmem:[%s7811_s4 + $0x88] sm:$0xff]   ;;  %v6196_v53 = vld [vmem:[%s7811_s4 + $0x160] sm:$0xff]  }
 0x10b   : > { %v5108_v59 = vpop.f32.mrf.mxu0 }
 0x10c   : > { %v5109_v28 = vadd.f32 %v5108_v59, %v5107_v58  ;;  %v692_v51 = vmax.f32 %v651_v43, 0.0  ;;  %v6145_v58 = vld [vmem:[%s7810_s3 + $0x20] sm:$0xff]   ;;  %v6157_v59 = vld [vmem:[%s7811_s4 + $0x28] sm:$0xff]   ;;  %v6190_v43 = vld [vmem:[%s7811_s4 + $0x178] sm:$0xff]  }
 0x10d   : > { %v5110_v60 = vpop.f32.mrf.mxu0 }
 0x10e   : > { %v654_v38 = vadd.f32 %v5109_v28, %v6652_v39 }
 0x10f   : > { %v5111_v61 = vpop.f32.mrf.mxu0 }
 0x110   : > { %v5112_v24 = vadd.f32 %v5111_v61, %v5110_v60  ;;  %v693_v47 = vmax.f32 %v654_v38, 0.0  ;;  %v6159_v60 = vld [vmem:[%s7811_s4 + $0x20] sm:$0xff]   ;;  %v6146_v61 = vld [vmem:[%s7810_s3 + $0x28] sm:$0xff]  }
 0x111   : > { %v5113_v62 = vpop.f32.mrf.mxu0 }
 0x112   : > { %v659_v35 = vadd.f32 %v5112_v24, %v6652_v39  ;;  %v703_v54 = vpack.c.bf16 %v693_v47, %v692_v51  ;;  %v6178_v24 = vld [vmem:[%s7811_s4 + $0xe8] sm:$0xff]   ;;  %v6192_v47 = vld [vmem:[%s7811_s4 + $0x170] sm:$0xff]   ;;  %v6195_v51 = vld [vmem:[%s7811_s4 + $0x120] sm:$0xff]  }
 0x113   : > { %v5114_v63 = vpop.f32.mrf.mxu0 }
 0x114   : > { %v5115_v20 = vadd.f32 %v5114_v63, %v5113_v62  ;;  %v694_v44 = vmax.f32 %v659_v35, 0.0  ;;  %v6147_v62 = vld [vmem:[%s7810_s3 + $0x30] sm:$0xff]   ;;  %v6161_v63 = vld [vmem:[%s7811_s4 + $0x18] sm:$0xff]  }
 0x115   : > { %v5116_v0 = vpop.f32.mrf.mxu0 }
 0x116   : > { %v662_v29 = vadd.f32 %v5115_v20, %v6652_v39 }
 0x117   : > { %v5117_v1 = vpop.f32.mrf.mxu0 }
 0x118   : > { %v5118_v16 = vadd.f32 %v5117_v1, %v5116_v0  ;;  %v695_v40 = vmax.f32 %v662_v29, 0.0  ;;  %v6165_v0 = vld [vmem:[%s7811_s4 + $0x10] sm:$0xff]   ;;  %v6148_v1 = vld [vmem:[%s7810_s3 + $0x38] sm:$0xff]  }
 0x119   : > { %v5119_v2 = vpop.f32.mrf.mxu0  ;;  %v6182_v29 = vld [vmem:[%s7811_s4 + $0xd8] sm:$0xff]  }
 0x11a   : > { %v667_v25 = vadd.f32 %v5118_v16, %v6652_v39  ;;  %v704_v49 = vpack.c.bf16 %v695_v40, %v694_v44  ;;  %v6173_v16 = vld [vmem:[%s7811_s4 + $0xb8] sm:$0xff]   ;;  %v6188_v40 = vld [vmem:[%s7811_s4 + $0xc0] sm:$0xff]  }
 0x11b   : > { %v5120_v3 = vpop.f32.mrf.mxu0 }
 0x11c   : > { %v5121_v12 = vadd.f32 %v5120_v3, %v5119_v2  ;;  %v696_v36 = vmax.f32 %v667_v25, 0.0  ;;  %v6149_v2 = vld [vmem:[%s7810_s3 + $0x40] sm:$0xff]   ;;  %v6170_v3 = vld [vmem:[%s7811_s4 + $0x8] sm:$0xff]  }
 0x11d   : > { %v5122_v4 = vpop.f32.mrf.mxu0  ;;  %v6179_v25 = vld [vmem:[%s7811_s4 + $0xa0] sm:$0xff]  }
 0x11e   : > { %v670_v21 = vadd.f32 %v5121_v12, %v6652_v39  ;;  %v6172_v12 = vld [vmem:[%s7811_s4] sm:$0xff]  }
 0x11f   : > { %v5123_v5 = vpop.f32.mrf.mxu0 }
 0x120   : > { %v5124_v10 = vadd.f32 %v5123_v5, %v5122_v4  ;;  %v697_v30 = vmax.f32 %v670_v21, 0.0  ;;  %v6150_v4 = vld [vmem:[%s7810_s3 + $0x48] sm:$0xff]   ;;  %v6154_v5 = vld [vmem:[%s7810_s3 + $0x50] sm:$0xff]  }
 0x121   : > { %v5125_v6 = vpop.f32.mrf.mxu0  ;;  %v6175_v21 = vld [vmem:[%s7811_s4 + $0xb0] sm:$0xff]  }
 0x122   : > { %v675_v17 = vadd.f32 %v5124_v10, %v6652_v39  ;;  %v705_v41 = vpack.c.bf16 %v697_v30, %v696_v36  ;;  %v6168_v10 = vld [vmem:[%s7810_s3 + $0x78] sm:$0xff]   ;;  %v6183_v30 = vld [vmem:[%s7811_s4 + $0x90] sm:$0xff]   ;;  %v6186_v36 = vld [vmem:[%s7811_s4 + $0xc8] sm:$0xff]  }
 0x123   : > { %v5126_v7 = vpop.f32.mrf.mxu0 }
 0x124   : > { %v5127_v8 = vadd.f32 %v5126_v7, %v5125_v6  ;;  %v698_v26 = vmax.f32 %v675_v17, 0.0  ;;  %v6155_v6 = vld [vmem:[%s7810_s3 + $0x58] sm:$0xff]   ;;  %v6163_v7 = vld [vmem:[%s7810_s3 + $0x60] sm:$0xff]  }
 0x125   : > { %v5128_v9 = vpop.f32.mrf.mxu0 }
 0x126   : > { %v678_v13 = vadd.f32 %v5127_v8, %v6652_v39  ;;  %v6164_v8 = vld [vmem:[%s7810_s3 + $0x68] sm:$0xff]  }
 0x127   : > { %v5129_v11 = vpop.f32.mrf.mxu0 }
 0x128   : > { %v5130_v14 = vadd.f32 %v5129_v11, %v5128_v9  ;;  %v699_v22 = vmax.f32 %v678_v13, 0.0  ;;  %v6167_v9 = vld [vmem:[%s7810_s3 + $0x70] sm:$0xff]   ;;  %v6171_v11 = vld [vmem:[%s7811_s4 + $0x40] sm:$0xff]  }
 0x129   : > { %v5131_v15 = vpop.f32.mrf.mxu0  ;;  %5483 = vmatpush3.bf16.msra.mxu0 %v6171_v11  ;;  %v6215_v11 = vld [vmem:[%s7811_s4 + $0x190] sm:$0xff]  }
 0x12a   : > { %v683_v18 = vadd.f32 %v5130_v14, %v6652_v39  ;;  %v706_v32 = vpack.c.bf16 %v699_v22, %v698_v26  ;;  %v6143_v39 = vld [vmem:[%s7810_s3 + $0x10] sm:$0xff]   ;;  %5508 = vmatprep.subr.bf16.mxu0 %v6454_v33  ;;  %v6180_v26 = vld [vmem:[%s7811_s4 + $0xe0] sm:$0xff]  }
 0x12b   : > { %v5132_v19 = vpop.f32.mrf.mxu0  ;;  %v6176_v22 = vld [vmem:[%s7811_s4 + $0xf0] sm:$0xff]  }
 0x12c   : > { %v700_v23 = vmax.f32 %v683_v18, 0.0  ;;  %v6174_v19 = vld [vmem:[%s7811_s4 + $0xf8] sm:$0xff]  }
 0x12e   : > { %v707_v27 = vpack.c.bf16 %v700_v23, %v700_v23  ;;  %v6177_v23 = vld [vmem:[%s7811_s4 + $0xa8] sm:$0xff]  }
 0x130   : > { %6062 = vmatprep.subr.msk.bf16.mxu1 %vm869_vm1, %v707_v27  ;;  %v871_v31 = vsel %vm869_vm1, %v707_v27, 0  ;;  %v6181_v27 = vld [vmem:[%s7811_s4 + $0x98] sm:$0xff]  }
 0x131   : > { %5423 = vmatpush3.bf16.msra.mxu1 %v871_v31 }
 0x132   : > { %5424 = vmatprep.subr.bf16.mxu1 %v706_v32 }
 0x135   : > { %5425 = vmatpush3.bf16.msra.mxu1 %v706_v32  ;;  %v6184_v32 = vld [vmem:[%s7811_s4 + $0xd0] sm:$0xff]  }
 0x136   : > { %5426 = vmatprep.subr.bf16.mxu1 %v705_v41 }
 0x139   : > { %5427 = vmatpush3.bf16.msra.mxu1 %v705_v41  ;;  %v6189_v41 = vld [vmem:[%s7811_s4 + $0x138] sm:$0xff]  }
 0x13a   : > { %5428 = vmatprep.subr.bf16.mxu1 %v704_v49 }
 0x13d   : > { %5429 = vmatpush3.bf16.msra.mxu1 %v704_v49  ;;  %v6193_v49 = vld [vmem:[%s7811_s4 + $0x128] sm:$0xff]  }
 0x13e   : > { %5430 = vmatprep.subr.bf16.mxu1 %v703_v54 }
 0x141   : > { %5431 = vmatpush3.bf16.msra.mxu1 %v703_v54  ;;  %v6197_v54 = vld [vmem:[%s7811_s4 + $0x118] sm:$0xff]  }
 0x142   : > { %5432 = vmatprep.subr.bf16.mxu1 %v702_v56 }
 0x145   : > { %5433 = vmatpush3.bf16.msra.mxu1 %v702_v56  ;;  %v6198_v56 = vld [vmem:[%s7811_s4 + $0x158] sm:$0xff]  }
 0x146   : > { %5434 = vmatprep.subr.bf16.mxu1 %v6668_v52 }
 0x149   : > { %5435 = vmatpush3.bf16.msra.mxu1 %v6668_v52  ;;  %v6144_v52 = vld [vmem:[%s7810_s3 + $0x18] sm:$0xff]  }
 0x14a   : > { %5488 = vmatprep.subr.bf16.mxu1 %v6454_v33 }
 0x14c   : > { %5437 = vmatmul.mubr.msk.bf16.vlgmr.msra.gmra.mxu1 %vm820_vm0, %v6142_v45  ;;  %v6199_v45 = vld [vmem:[%s7811_s4 + $0x110] sm:$0xff]  }
 0x14d   : > { %5440 = vmatprep.mubr.msk.bf16.mxu1 %vm820_vm0, %v6143_v39  ;;  %5489 = vmatpush3.bf16.msra.mxu1 %v6151_v48  ;;  %v6200_v48 = vld [vmem:[%s7811_s4 + $0x150] sm:$0xff]  }
 0x14e   : > { %5490 = vmatprep.subr.bf16.mxu1 %v6454_v33 }
 0x151   : > { %5491 = vmatpush3.bf16.msra.mxu1 %v6153_v57  ;;  %v6201_v57 = vld [vmem:[%s7811_s4 + $0x108] sm:$0xff]  }
 0x152   : > { %5492 = vmatprep.subr.bf16.mxu1 %v6454_v33 }
 0x154   : > { %5441 = vmatmul.mubr.msk.bf16.gmra.mxu1 %vm820_vm0, %v6144_v52 }
 0x155   : > { %5444 = vmatprep.mubr.msk.bf16.mxu1 %vm820_vm0, %v6145_v58  ;;  %5493 = vmatpush3.bf16.msra.mxu1 %v6157_v59  ;;  %v6202_v58 = vld [vmem:[%s7811_s4 + $0x148] sm:$0xff]   ;;  %v6203_v59 = vld [vmem:[%s7811_s4 + $0x100] sm:$0xff]  }
 0x156   : > { %5494 = vmatprep.subr.bf16.mxu1 %v6454_v33 }
 0x159   : > { %5495 = vmatpush3.bf16.msra.mxu1 %v6159_v60 }
 0x15a   : > { %5496 = vmatprep.subr.bf16.mxu1 %v6454_v33 }
 0x15c   : > { %5445 = vmatmul.mubr.msk.bf16.gmra.mxu1 %vm820_vm0, %v6146_v61  ;;  %v6204_v61 = vld [vmem:[%s7811_s4 + $0x140] sm:$0xff]  }
 0x15d   : > { %5448 = vmatprep.mubr.msk.bf16.mxu1 %vm820_vm0, %v6147_v62  ;;  %5497 = vmatpush3.bf16.msra.mxu1 %v6161_v63  ;;  %v6205_v62 = vld [vmem:[%s7811_s4 + $0x1b8] sm:$0xff]  }
 0x15e   : > { %5498 = vmatprep.subr.bf16.mxu1 %v6454_v33 }
 0x161   : > { %5499 = vmatpush3.bf16.msra.mxu1 %v6165_v0  ;;  %v6206_v0 = vld [vmem:[%s7811_s4 + $0x1f8] sm:$0xff]  }
 0x162   : > { %5500 = vmatprep.subr.bf16.mxu1 %v6454_v33 }
 0x164   : > { %5449 = vmatmul.mubr.msk.bf16.gmra.mxu1 %vm820_vm0, %v6148_v1 }
 0x165   : > { %5452 = vmatprep.mubr.msk.bf16.mxu1 %vm820_vm0, %v6149_v2  ;;  %5501 = vmatpush3.bf16.msra.mxu1 %v6170_v3  ;;  %v6207_v2 = vld [vmem:[%s7811_s4 + $0x1b0] sm:$0xff]  }
 0x166   : > { %5502 = vmatprep.subr.bf16.mxu1 %v6454_v33  ;;  %v6208_v3 = vld [vmem:[%s7811_s4 + $0x1f0] sm:$0xff]  }
 0x169   : > { %5503 = vmatpush3.bf16.msra.mxu1 %v6172_v12 }
 0x16a   : > { %5528 = vmatprep.subr.bf16.mxu1 %v6454_v33 }
 0x16c   : > { %5453 = vmatmul.mubr.msk.bf16.gmra.mxu1 %vm820_vm0, %v6150_v4  ;;  %v6209_v4 = vld [vmem:[%s7811_s4 + $0x1a8] sm:$0xff]  }
 0x16d   : > { %5456 = vmatprep.mubr.msk.bf16.mxu1 %vm820_vm0, %v6154_v5  ;;  %v6210_v5 = vld [vmem:[%s7811_s4 + $0x1e8] sm:$0xff]  }
 0x174   : > { %5457 = vmatmul.mubr.msk.bf16.gmra.mxu1 %vm820_vm0, %v6155_v6  ;;  %v6211_v6 = vld [vmem:[%s7811_s4 + $0x1a0] sm:$0xff]  }
 0x175   : > { %5460 = vmatprep.mubr.msk.bf16.mxu1 %vm820_vm0, %v6163_v7  ;;  %v6212_v7 = vld [vmem:[%s7811_s4 + $0x1e0] sm:$0xff]  }
 0x17c   : > { %5461 = vmatmul.mubr.msk.bf16.gmra.mxu1 %vm820_vm0, %v6164_v8  ;;  %v6213_v8 = vld [vmem:[%s7811_s4 + $0x198] sm:$0xff]  }
 0x17d   : > { %5464 = vmatprep.mubr.msk.bf16.mxu1 %vm820_vm0, %v6167_v9 }
 0x184   : > { %5465 = vmatmul.mubr.msk.bf16.gmra.mxu1 %vm820_vm0, %v6168_v10  ;;  %v6214_v10 = vld [vmem:[%s7811_s4 + $0x1d8] sm:$0xff]  }
 0x185   : > { %5504 = vmatprep.mubr.msk.bf16.mxu1 %vm6455_vm2, %v6454_v33 }
 0x20c   : > { %v5438_v13 = vpop.f32.mrf.mxu1 }
 0x20e   : > { %v907_v14 = vpop.f32.mrf.mxu1 }
 0x210   : > { %v5439_v15 = vpop.f32.mrf.mxu1 }
 0x211   : > { %v1035_v17 = vpack.c.bf16 %v5439_v15, %v5438_v13  ;;  %v6216_v13 = vld [vmem:[%s7811_s4 + $0x1d0] sm:$0xff]  }
 0x212   : > { %v910_v18 = vpop.f32.mrf.mxu1 }
 0x213   : > { %v1034_v20 = vpack.c.bf16 %v910_v18, %v907_v14  ;;  %5485 = vmatmul.mubr.bf16.vlgmr.msra.gmra.mxu0 %v1035_v17  ;;  %v6217_v14 = vld [vmem:[%s7811_s4 + $0x188] sm:$0xff]   ;;  %v6219_v17 = vld [vmem:[%s7811_s4 + $0x180] sm:$0xff]  }
 0x214   : > { %5509 = vmatpush3.bf16.msra.mxu0 %v6173_v16  ;;  %5524 = vmatprep.mubr.msk.bf16.mxu0 %vm6455_vm2, %v6454_v33  ;;  %v5442_v28 = vpop.f32.mrf.mxu1  ;;  %v6218_v16 = vld [vmem:[%s7811_s4 + $0x1c8] sm:$0xff]  }
 0x215   : > { %5505 = vmatmul.mubr.bf16.vlgmr.msra.gmra.mxu1 %v1034_v20  ;;  %5510 = vmatprep.subr.bf16.mxu0 %v6454_v33  ;;  %v6221_v20 = vld [vmem:[%s7811_s4 + $0x238] sm:$0xff]  }
 0x216   : > { %5529 = vmatpush3.bf16.msra.mxu1 %v6174_v19  ;;  %5544 = vmatprep.mubr.msk.bf16.mxu1 %vm6455_vm2, %v6454_v33  ;;  %v923_v31 = vpop.f32.mrf.mxu1  ;;  %v6220_v19 = vld [vmem:[%s7811_s4 + $0x1c0] sm:$0xff]  }
 0x217   : > { %5530 = vmatprep.subr.bf16.mxu1 %v6454_v33 }
 0x218   : > { %5511 = vmatpush3.bf16.msra.mxu0 %v6175_v21  ;;  %v5443_v35 = vpop.f32.mrf.mxu1 }
 0x219   : > { %5512 = vmatprep.subr.bf16.mxu0 %v6454_v33  ;;  %v1037_v44 = vpack.c.bf16 %v5443_v35, %v5442_v28  ;;  %v6227_v28 = vld [vmem:[%s7811_s4 + $0x220] sm:$0xff]  }
 0x21a   : > { %5531 = vmatpush3.bf16.msra.mxu1 %v6176_v22  ;;  %v926_v38 = vpop.f32.mrf.mxu1  ;;  %v6222_v22 = vld [vmem:[%s7811_s4 + $0x278] sm:$0xff]  }
 0x21b   : > { %5532 = vmatprep.subr.bf16.mxu1 %v6454_v33  ;;  %v1036_v42 = vpack.c.bf16 %v926_v38, %v923_v31 }
 0x21c   : > { %5513 = vmatpush3.bf16.msra.mxu0 %v6177_v23  ;;  %v5446_v55 = vpop.f32.mrf.mxu1 }
 0x21d   : > { %5514 = vmatprep.subr.bf16.mxu0 %v6454_v33 }
 0x21e   : > { %5533 = vmatpush3.bf16.msra.mxu1 %v6178_v24  ;;  %v939_v39 = vpop.f32.mrf.mxu1  ;;  %v6223_v24 = vld [vmem:[%s7811_s4 + $0x230] sm:$0xff]  }
 0x21f   : > { %5534 = vmatprep.subr.bf16.mxu1 %v6454_v33 }
 0x220   : > { %5515 = vmatpush3.bf16.msra.mxu0 %v6179_v25  ;;  %v5447_v52 = vpop.f32.mrf.mxu1  ;;  %v6224_v25 = vld [vmem:[%s7811_s4 + $0x270] sm:$0xff]  }
 0x221   : > { %5516 = vmatprep.subr.bf16.mxu0 %v6454_v33  ;;  %v1039_v1 = vpack.c.bf16 %v5447_v52, %v5446_v55  ;;  %v6243_v55 = vld [vmem:[%s7811_s4 + $0x2a0] sm:$0xff]  }
 0x222   : > { %5535 = vmatpush3.bf16.msra.mxu1 %v6180_v26  ;;  %v942_v60 = vpop.f32.mrf.mxu1  ;;  %v6225_v26 = vld [vmem:[%s7811_s4 + $0x228] sm:$0xff]  }
 0x223   : > { %5536 = vmatprep.subr.bf16.mxu1 %v6454_v33  ;;  %v1038_v63 = vpack.c.bf16 %v942_v60, %v939_v39 }
 0x224   : > { %5517 = vmatpush3.bf16.msra.mxu0 %v6181_v27  ;;  %v5450_v9 = vpop.f32.mrf.mxu1  ;;  %v6226_v27 = vld [vmem:[%s7811_s4 + $0x268] sm:$0xff]  }
 0x225   : > { %5518 = vmatprep.subr.bf16.mxu0 %v6454_v33 }
 0x226   : > { %5537 = vmatpush3.bf16.msra.mxu1 %v6182_v29  ;;  %v955_v12 = vpop.f32.mrf.mxu1  ;;  %v6228_v29 = vld [vmem:[%s7811_s4 + $0x260] sm:$0xff]  }
 0x227   : > { %5538 = vmatprep.subr.bf16.mxu1 %v6454_v33 }
 0x228   : > { %5519 = vmatpush3.bf16.msra.mxu0 %v6183_v30  ;;  %v5451_v15 = vpop.f32.mrf.mxu1  ;;  %v6229_v30 = vld [vmem:[%s7811_s4 + $0x218] sm:$0xff]  }
 0x229   : > { %5520 = vmatprep.subr.bf16.mxu0 %v6454_v33  ;;  %v1041_v23 = vpack.c.bf16 %v5451_v15, %v5450_v9  ;;  %v6258_v9 = vld [vmem:[%s7811_s4 + $0x368] sm:$0xff]   ;;  %v6262_v15 = vld [vmem:[%s7811_s4 + $0x358] sm:$0xff]  }
 0x22a   : > { %5539 = vmatpush3.bf16.msra.mxu1 %v6184_v32  ;;  %v958_v18 = vpop.f32.mrf.mxu1  ;;  %v6230_v32 = vld [vmem:[%s7811_s4 + $0x258] sm:$0xff]  }
 0x22b   : > { %5540 = vmatprep.subr.bf16.mxu1 %v6454_v33  ;;  %v1040_v21 = vpack.c.bf16 %v958_v18, %v955_v12  ;;  %v6260_v12 = vld [vmem:[%s7811_s4 + $0x360] sm:$0xff]   ;;  %v6264_v18 = vld [vmem:[%s7811_s4 + $0x350] sm:$0xff]  }
 0x22c   : > { %5521 = vmatpush3.bf16.msra.mxu0 %v6185_v34  ;;  %v5454_v31 = vpop.f32.mrf.mxu1  ;;  %v6231_v34 = vld [vmem:[%s7811_s4 + $0x210] sm:$0xff]  }
 0x22d   : > { %5522 = vmatprep.subr.bf16.mxu0 %v6454_v33 }
 0x22e   : > { %5541 = vmatpush3.bf16.msra.mxu1 %v6186_v36  ;;  %v971_v35 = vpop.f32.mrf.mxu1  ;;  %v6232_v36 = vld [vmem:[%s7811_s4 + $0x250] sm:$0xff]  }
 0x22f   : > { %5542 = vmatprep.subr.bf16.mxu1 %v6454_v33 }
 0x230   : > { %5523 = vmatpush3.bf16.msra.mxu0 %v6187_v37  ;;  %v6233_v37 = vld [vmem:[%s7811_s4 + $0x208] sm:$0xff]   ;;  %v5455_v38 = vpop.f32.mrf.mxu1 }
 0x231   : > { %5548 = vmatprep.subr.bf16.mxu0 %v6454_v33 }
 0x232   : > { %5543 = vmatpush3.bf16.msra.mxu1 %v6188_v40  ;;  %v6234_v40 = vld [vmem:[%s7811_s4 + $0x248] sm:$0xff]  }
 0x233   : > { %5525 = vmatmul.mubr.bf16.vlgmr.msra.gmra.mxu0 %v1036_v42  ;;  %5568 = vmatprep.subr.bf16.mxu1 %v6454_v33  ;;  %v974_v42 = vpop.f32.mrf.mxu1 }
 0x234   : > { %5549 = vmatpush3.bf16.msra.mxu0 %v6189_v41  ;;  %5564 = vmatprep.mubr.msk.bf16.mxu0 %vm6455_vm2, %v6454_v33  ;;  %v6235_v41 = vld [vmem:[%s7811_s4 + $0x200] sm:$0xff]  }
 0x235   : > { %5545 = vmatmul.mubr.bf16.vlgmr.msra.gmra.mxu1 %v1037_v44  ;;  %5550 = vmatprep.subr.bf16.mxu0 %v6454_v33  ;;  %v6237_v44 = vld [vmem:[%s7811_s4 + $0x2b8] sm:$0xff]   ;;  %v5458_v39 = vpop.f32.mrf.mxu1 }
 0x236   : > { %5569 = vmatpush3.bf16.msra.mxu1 %v6190_v43  ;;  %5584 = vmatprep.mubr.msk.bf16.mxu1 %vm6455_vm2, %v6454_v33  ;;  %v6236_v43 = vld [vmem:[%s7811_s4 + $0x240] sm:$0xff]  }
 0x237   : > { %5570 = vmatprep.subr.bf16.mxu1 %v6454_v33  ;;  %v987_v52 = vpop.f32.mrf.mxu1 }
 0x238   : > { %5551 = vmatpush3.bf16.msra.mxu0 %v6191_v46  ;;  %v1042_v46 = vpack.c.bf16 %v974_v42, %v971_v35 }
 0x239   : > { %5552 = vmatprep.subr.bf16.mxu0 %v6454_v33  ;;  %v5459_v60 = vpop.f32.mrf.mxu1 }
 0x23a   : > { %5571 = vmatpush3.bf16.msra.mxu1 %v6192_v47  ;;  %v6238_v47 = vld [vmem:[%s7811_s4 + $0x2f8] sm:$0xff]  }
 0x23b   : > { %5572 = vmatprep.subr.bf16.mxu1 %v6454_v33 }
 0x23c   : > { %5553 = vmatpush3.bf16.msra.mxu0 %v6193_v49  ;;  %v1043_v49 = vpack.c.bf16 %v5455_v38, %v5454_v31 }
 0x23d   : > { %5554 = vmatprep.subr.bf16.mxu0 %v6454_v33 }
 0x23e   : > { %5573 = vmatpush3.bf16.msra.mxu1 %v6194_v50  ;;  %v6239_v50 = vld [vmem:[%s7811_s4 + $0x2b0] sm:$0xff]  }
 0x23f   : > { %5574 = vmatprep.subr.bf16.mxu1 %v6454_v33 }
 0x240   : > { %5555 = vmatpush3.bf16.msra.mxu0 %v6195_v51  ;;  %v6240_v51 = vld [vmem:[%s7811_s4 + $0x2f0] sm:$0xff]  }
 0x241   : > { %5556 = vmatprep.subr.bf16.mxu0 %v6454_v33 }
 0x242   : > { %5575 = vmatpush3.bf16.msra.mxu1 %v6196_v53  ;;  %v6241_v53 = vld [vmem:[%s7811_s4 + $0x2a8] sm:$0xff]  }
 0x243   : > { %5576 = vmatprep.subr.bf16.mxu1 %v6454_v33 }
 0x244   : > { %5557 = vmatpush3.bf16.msra.mxu0 %v6197_v54  ;;  %v6242_v54 = vld [vmem:[%s7811_s4 + $0x2e8] sm:$0xff]  }
 0x245   : > { %5558 = vmatprep.subr.bf16.mxu0 %v6454_v33 }
 0x246   : > { %5577 = vmatpush3.bf16.msra.mxu1 %v6198_v56  ;;  %v6244_v56 = vld [vmem:[%s7811_s4 + $0x2e0] sm:$0xff]  }
 0x247   : > { %5578 = vmatprep.subr.bf16.mxu1 %v6454_v33 }
 0x248   : > { %5559 = vmatpush3.bf16.msra.mxu0 %v6199_v45  ;;  %v6245_v45 = vld [vmem:[%s7811_s4 + $0x298] sm:$0xff]  }
 0x249   : > { %5560 = vmatprep.subr.bf16.mxu0 %v6454_v33 }
 0x24a   : > { %5579 = vmatpush3.bf16.msra.mxu1 %v6200_v48  ;;  %v6246_v48 = vld [vmem:[%s7811_s4 + $0x2d8] sm:$0xff]  }
 0x24b   : > { %5580 = vmatprep.subr.bf16.mxu1 %v6454_v33 }
 0x24c   : > { %5561 = vmatpush3.bf16.msra.mxu0 %v6201_v57  ;;  %v6247_v57 = vld [vmem:[%s7811_s4 + $0x290] sm:$0xff]  }
 0x24d   : > { %5562 = vmatprep.subr.bf16.mxu0 %v6454_v33 }
 0x24e   : > { %5581 = vmatpush3.bf16.msra.mxu1 %v6202_v58  ;;  %v6248_v58 = vld [vmem:[%s7811_s4 + $0x2d0] sm:$0xff]  }
 0x24f   : > { %5582 = vmatprep.subr.bf16.mxu1 %v6454_v33 }
 0x250   : > { %5563 = vmatpush3.bf16.msra.mxu0 %v6203_v59  ;;  %v6249_v59 = vld [vmem:[%s7811_s4 + $0x288] sm:$0xff]  }
 0x251   : > { %5588 = vmatprep.subr.bf16.mxu0 %v6454_v33 }
 0x252   : > { %5583 = vmatpush3.bf16.msra.mxu1 %v6204_v61  ;;  %v6250_v61 = vld [vmem:[%s7811_s4 + $0x2c8] sm:$0xff]  }
 0x253   : > { %5565 = vmatmul.mubr.bf16.vlgmr.msra.gmra.mxu0 %v1038_v63  ;;  %5608 = vmatprep.subr.bf16.mxu1 %v6454_v33  ;;  %v990_v63 = vpop.f32.mrf.mxu1 }
 0x254   : > { %5589 = vmatpush3.bf16.msra.mxu0 %v6205_v62  ;;  %5604 = vmatprep.mubr.msk.bf16.mxu0 %vm6455_vm2, %v6454_v33  ;;  %v6251_v62 = vld [vmem:[%s7811_s4 + $0x280] sm:$0xff]  }
 0x255   : > { %5585 = vmatmul.mubr.bf16.vlgmr.msra.gmra.mxu1 %v1039_v1  ;;  %5590 = vmatprep.subr.bf16.mxu0 %v6454_v33  ;;  %v6253_v1 = vld [vmem:[%s7811_s4 + $0x338] sm:$0xff]  }
 0x256   : > { %5609 = vmatpush3.bf16.msra.mxu1 %v6206_v0  ;;  %5624 = vmatprep.mubr.msk.bf16.mxu1 %vm6455_vm2, %v6454_v33  ;;  %v6252_v0 = vld [vmem:[%s7811_s4 + $0x2c0] sm:$0xff]  }
 0x257   : > { %5610 = vmatprep.subr.bf16.mxu1 %v6454_v33 }
 0x258   : > { %5591 = vmatpush3.bf16.msra.mxu0 %v6207_v2  ;;  %v1044_v2 = vpack.c.bf16 %v990_v63, %v987_v52 }
 0x259   : > { %5592 = vmatprep.subr.bf16.mxu0 %v6454_v33 }
 0x25a   : > { %5611 = vmatpush3.bf16.msra.mxu1 %v6208_v3  ;;  %v6254_v3 = vld [vmem:[%s7811_s4 + $0x378] sm:$0xff]  }
 0x25b   : > { %5612 = vmatprep.subr.bf16.mxu1 %v6454_v33 }
 0x25c   : > { %5593 = vmatpush3.bf16.msra.mxu0 %v6209_v4  ;;  %v1045_v4 = vpack.c.bf16 %v5459_v60, %v5458_v39  ;;  %v6283_v39 = vld [vmem:[%s7811_s4 + $0x380] sm:$0xff]  }
 0x25d   : > { %5594 = vmatprep.subr.bf16.mxu0 %v6454_v33 }
 0x25e   : > { %5613 = vmatpush3.bf16.msra.mxu1 %v6210_v5  ;;  %v6255_v5 = vld [vmem:[%s7811_s4 + $0x330] sm:$0xff]  }
 0x25f   : > { %5614 = vmatprep.subr.bf16.mxu1 %v6454_v33 }
 0x260   : > { %5595 = vmatpush3.bf16.msra.mxu0 %v6211_v6  ;;  %v6256_v6 = vld [vmem:[%s7811_s4 + $0x370] sm:$0xff]  }
 0x261   : > { %5596 = vmatprep.subr.bf16.mxu0 %v6454_v33 }
 0x262   : > { %5615 = vmatpush3.bf16.msra.mxu1 %v6212_v7  ;;  %v5462_v7 = vpop.f32.mrf.mxu1 }
 0x263   : > { %5616 = vmatprep.subr.bf16.mxu1 %v6454_v33 }
 0x264   : > { %5597 = vmatpush3.bf16.msra.mxu0 %v6213_v8  ;;  %v6257_v8 = vld [vmem:[%s7811_s4 + $0x328] sm:$0xff]  }
 0x265   : > { %5598 = vmatprep.subr.bf16.mxu0 %v6454_v33 }
 0x266   : > { %5617 = vmatpush3.bf16.msra.mxu1 %v6214_v10  ;;  %v1003_v10 = vpop.f32.mrf.mxu1 }
 0x267   : > { %5618 = vmatprep.subr.bf16.mxu1 %v6454_v33 }
 0x268   : > { %5599 = vmatpush3.bf16.msra.mxu0 %v6215_v11  ;;  %v6259_v11 = vld [vmem:[%s7811_s4 + $0x320] sm:$0xff]  }
 0x269   : > { %5600 = vmatprep.subr.bf16.mxu0 %v6454_v33 }
 0x26a   : > { %5619 = vmatpush3.bf16.msra.mxu1 %v6216_v13  ;;  %v5463_v13 = vpop.f32.mrf.mxu1 }
 0x26b   : > { %5620 = vmatprep.subr.bf16.mxu1 %v6454_v33 }
 0x26c   : > { %5601 = vmatpush3.bf16.msra.mxu0 %v6217_v14  ;;  %v6261_v14 = vld [vmem:[%s7811_s4 + $0x318] sm:$0xff]  }
 0x26d   : > { %5602 = vmatprep.subr.bf16.mxu0 %v6454_v33 }
 0x26e   : > { %5621 = vmatpush3.bf16.msra.mxu1 %v6218_v16  ;;  %v1006_v16 = vpop.f32.mrf.mxu1 }
 0x26f   : > { %5622 = vmatprep.subr.bf16.mxu1 %v6454_v33 }
 0x270   : > { %5603 = vmatpush3.bf16.msra.mxu0 %v6219_v17  ;;  %v6263_v17 = vld [vmem:[%s7811_s4 + $0x310] sm:$0xff]  }
 0x271   : > { %5628 = vmatprep.subr.bf16.mxu0 %v6454_v33 }
 0x272   : > { %5623 = vmatpush3.bf16.msra.mxu1 %v6220_v19  ;;  %v7184_v19 = vpop.f32.mrf.mxu1 }
 0x273   : > { %5605 = vmatmul.mubr.bf16.vlgmr.msra.gmra.mxu0 %v1040_v21  ;;  %5648 = vmatprep.subr.bf16.mxu1 %v6454_v33  ;;  %v6266_v21 = vld [vmem:[%s7811_s4 + $0x348] sm:$0xff]  }
 0x274   : > { %5629 = vmatpush3.bf16.msra.mxu0 %v6221_v20  ;;  %5644 = vmatprep.mubr.msk.bf16.mxu0 %vm6455_vm2, %v6454_v33  ;;  %v6265_v20 = vld [vmem:[%s7811_s4 + $0x308] sm:$0xff]  }
 0x275   : > { %5625 = vmatmul.mubr.bf16.vlgmr.msra.gmra.mxu1 %v1041_v23  ;;  %5630 = vmatprep.subr.bf16.mxu0 %v6454_v33  ;;  %v6267_v23 = vld [vmem:[%s7811_s4 + $0x300] sm:$0xff]  }
 0x276   : > { %5649 = vmatpush3.bf16.msra.mxu1 %v6222_v22  ;;  %5664 = vmatprep.mubr.msk.bf16.mxu1 %vm6455_vm2, %v6454_v33  ;;  %v7194_v22 = vpop.f32.mrf.mxu1 }
 0x277   : > { %5650 = vmatprep.subr.bf16.mxu1 %v6454_v33 }
 0x278   : > { %5631 = vmatpush3.bf16.msra.mxu0 %v6223_v24  ;;  %v6268_v24 = vld [vmem:[%s7811_s4 + $0x340] sm:$0xff]  }
 0x279   : > { %5632 = vmatprep.subr.bf16.mxu0 %v6454_v33 }
 0x27a   : > { %5651 = vmatpush3.bf16.msra.mxu1 %v6224_v25  ;;  %v7204_v25 = vpop.f32.mrf.mxu1 }
 0x27b   : > { %5652 = vmatprep.subr.bf16.mxu1 %v6454_v33  ;;  %v1049_v52 = vpack.c.bf16 %v7204_v25, %v7184_v19 }
 0x27c   : > { %5633 = vmatpush3.bf16.msra.mxu0 %v6225_v26  ;;  %v6269_v26 = vld [vmem:[%s7811_s4 + $0x3b8] sm:$0xff]  }
 0x27d   : > { %5634 = vmatprep.subr.bf16.mxu0 %v6454_v33 }
 0x27e   : > { %5653 = vmatpush3.bf16.msra.mxu1 %v6226_v27  ;;  %v1046_v27 = vpack.c.bf16 %v1006_v16, %v1003_v10 }
 0x27f   : > { %5654 = vmatprep.subr.bf16.mxu1 %v6454_v33 }
 0x280   : > { %5635 = vmatpush3.bf16.msra.mxu0 %v6227_v28  ;;  %v6270_v28 = vld [vmem:[%s7811_s4 + $0x3f8] sm:$0xff]  }
 0x281   : > { %5636 = vmatprep.subr.bf16.mxu0 %v6454_v33 }
 0x282   : > { %5655 = vmatpush3.bf16.msra.mxu1 %v6228_v29  ;;  %v1047_v29 = vpack.c.bf16 %v5463_v13, %v5462_v7 }
 0x283   : > { %5656 = vmatprep.subr.bf16.mxu1 %v6454_v33 }
 0x284   : > { %5637 = vmatpush3.bf16.msra.mxu0 %v6229_v30  ;;  %v7214_v30 = vpop.f32.mrf.mxu1 }
 0x285   : > { %5638 = vmatprep.subr.bf16.mxu0 %v6454_v33 }
 0x286   : > { %5657 = vmatpush3.bf16.msra.mxu1 %v6230_v32  ;;  %v6271_v32 = vld [vmem:[%s7811_s4 + $0x3b0] sm:$0xff]  }
 0x287   : > { %5658 = vmatprep.subr.bf16.mxu1 %v6454_v33 }
 0x288   : > { %5639 = vmatpush3.bf16.msra.mxu0 %v6231_v34 }
 0x289   : > { %5640 = vmatprep.subr.bf16.mxu0 %v6454_v33 }
 0x28a   : > { %5659 = vmatpush3.bf16.msra.mxu1 %v6232_v36 }
 0x28b   : > { %5660 = vmatprep.subr.bf16.mxu1 %v6454_v33 }
 0x28c   : > { %5641 = vmatpush3.bf16.msra.mxu0 %v6233_v37  ;;  %v6272_v37 = vld [vmem:[%s7811_s4 + $0x3f0] sm:$0xff]  }
 0x28d   : > { %5642 = vmatprep.subr.bf16.mxu0 %v6454_v33 }
 0x28e   : > { %5661 = vmatpush3.bf16.msra.mxu1 %v6234_v40 }
 0x28f   : > { %5662 = vmatprep.subr.bf16.mxu1 %v6454_v33 }
 0x290   : > { %5643 = vmatpush3.bf16.msra.mxu0 %v6235_v41  ;;  %v6273_v41 = vld [vmem:[%s7811_s4 + $0x3a8] sm:$0xff]  }
 0x291   : > { %5668 = vmatprep.subr.bf16.mxu0 %v6454_v33 }
 0x292   : > { %5663 = vmatpush3.bf16.msra.mxu1 %v6236_v43 }
 0x293   : > { %5645 = vmatmul.mubr.bf16.vlgmr.msra.gmra.mxu0 %v1042_v46  ;;  %5688 = vmatprep.subr.bf16.mxu1 %v6454_v33  ;;  %v6274_v46 = vld [vmem:[%s7811_s4 + $0x3e8] sm:$0xff]  }
 0x294   : > { %5669 = vmatpush3.bf16.msra.mxu0 %v6237_v44  ;;  %5684 = vmatprep.mubr.msk.bf16.mxu0 %vm6455_vm2, %v6454_v33 }
 0x295   : > { %5665 = vmatmul.mubr.bf16.vlgmr.msra.gmra.mxu1 %v1043_v49  ;;  %5670 = vmatprep.subr.bf16.mxu0 %v6454_v33  ;;  %v6275_v49 = vld [vmem:[%s7811_s4 + $0x3a0] sm:$0xff]  }
 0x296   : > { %5689 = vmatpush3.bf16.msra.mxu1 %v6238_v47  ;;  %5704 = vmatprep.mubr.msk.bf16.mxu1 %vm6455_vm2, %v6454_v33 }
 0x297   : > { %5690 = vmatprep.subr.bf16.mxu1 %v6454_v33 }
 0x298   : > { %5671 = vmatpush3.bf16.msra.mxu0 %v6239_v50  ;;  %v6276_v50 = vld [vmem:[%s7811_s4 + $0x3e0] sm:$0xff]  }
 0x299   : > { %5672 = vmatprep.subr.bf16.mxu0 %v6454_v33 }
 0x29a   : > { %5691 = vmatpush3.bf16.msra.mxu1 %v6240_v51  ;;  %v6277_v51 = vld [vmem:[%s7811_s4 + $0x398] sm:$0xff]  }
 0x29b   : > { %5692 = vmatprep.subr.bf16.mxu1 %v6454_v33 }
 0x29c   : > { %5673 = vmatpush3.bf16.msra.mxu0 %v6241_v53  ;;  %v6278_v53 = vld [vmem:[%s7811_s4 + $0x3d8] sm:$0xff]  }
 0x29d   : > { %5674 = vmatprep.subr.bf16.mxu0 %v6454_v33 }
 0x29e   : > { %5693 = vmatpush3.bf16.msra.mxu1 %v6242_v54  ;;  %v6279_v54 = vld [vmem:[%s7811_s4 + $0x390] sm:$0xff]  }
 0x29f   : > { %5694 = vmatprep.subr.bf16.mxu1 %v6454_v33 }
 0x2a0   : > { %5675 = vmatpush3.bf16.msra.mxu0 %v6243_v55  ;;  %v6280_v55 = vld [vmem:[%s7811_s4 + $0x3d0] sm:$0xff]  }
 0x2a1   : > { %5676 = vmatprep.subr.bf16.mxu0 %v6454_v33 }
 0x2a2   : > { %5695 = vmatpush3.bf16.msra.mxu1 %v6244_v56  ;;  %v6281_v56 = vld [vmem:[%s7811_s4 + $0x388] sm:$0xff]  }
 0x2a3   : > { %5696 = vmatprep.subr.bf16.mxu1 %v6454_v33 }
 0x2a4   : > { %5677 = vmatpush3.bf16.msra.mxu0 %v6245_v45  ;;  %v6282_v45 = vld [vmem:[%s7811_s4 + $0x3c8] sm:$0xff]  }
 0x2a5   : > { %5678 = vmatprep.subr.bf16.mxu0 %v6454_v33 }
 0x2a6   : > { %5697 = vmatpush3.bf16.msra.mxu1 %v6246_v48  ;;  %v6284_v48 = vld [vmem:[%s7811_s4 + $0x3c0] sm:$0xff]  }
 0x2a7   : > { %5698 = vmatprep.subr.bf16.mxu1 %v6454_v33 }
 0x2a8   : > { %5679 = vmatpush3.bf16.msra.mxu0 %v6247_v57  ;;  %v1048_v57 = vpack.c.bf16 %v7214_v30, %v7194_v22 }
 0x2a9   : > { %5680 = vmatprep.subr.bf16.mxu0 %v6454_v33 }
 0x2aa   : > { %5699 = vmatpush3.bf16.msra.mxu1 %v6248_v58 }
 0x2ab   : > { %5700 = vmatprep.subr.bf16.mxu1 %v6454_v33 }
 0x2ac   : > { %5681 = vmatpush3.bf16.msra.mxu0 %v6249_v59 }
 0x2ad   : > { %5682 = vmatprep.subr.bf16.mxu0 %v6454_v33 }
 0x2ae   : > { %5701 = vmatpush3.bf16.msra.mxu1 %v6250_v61 }
 0x2af   : > { %5702 = vmatprep.subr.bf16.mxu1 %v6454_v33 }
 0x2b0   : > { %5683 = vmatpush3.bf16.msra.mxu0 %v6251_v62 }
 0x2b1   : > { %5708 = vmatprep.subr.bf16.mxu0 %v6454_v33 }
 0x2b2   : > { %5703 = vmatpush3.bf16.msra.mxu1 %v6252_v0 }
 0x2b3   : > { %5685 = vmatmul.mubr.bf16.vlgmr.msra.gmra.mxu0 %v1044_v2  ;;  %5728 = vmatprep.subr.bf16.mxu1 %v6454_v33 }
 0x2b4   : > { %5709 = vmatpush3.bf16.msra.mxu0 %v6253_v1  ;;  %5724 = vmatprep.mubr.msk.bf16.mxu0 %vm6455_vm2, %v6454_v33 }
 0x2b5   : > { %5705 = vmatmul.mubr.bf16.vlgmr.msra.gmra.mxu1 %v1045_v4  ;;  %5710 = vmatprep.subr.bf16.mxu0 %v6454_v33 }
 0x2b6   : > { %5729 = vmatpush3.bf16.msra.mxu1 %v6254_v3  ;;  %5744 = vmatprep.mubr.msk.bf16.mxu1 %vm6455_vm2, %v6454_v33 }
 0x2b7   : > { %5730 = vmatprep.subr.bf16.mxu1 %v6454_v33 }
 0x2b8   : > { %5711 = vmatpush3.bf16.msra.mxu0 %v6255_v5 }
 0x2b9   : > { %5712 = vmatprep.subr.bf16.mxu0 %v6454_v33 }
 0x2ba   : > { %5731 = vmatpush3.bf16.msra.mxu1 %v6256_v6 }
 0x2bb   : > { %5732 = vmatprep.subr.bf16.mxu1 %v6454_v33 }
 0x2bc   : > { %5713 = vmatpush3.bf16.msra.mxu0 %v6257_v8 }
 0x2bd   : > { %5714 = vmatprep.subr.bf16.mxu0 %v6454_v33 }
 0x2be   : > { %5733 = vmatpush3.bf16.msra.mxu1 %v6258_v9 }
 0x2bf   : > { %5734 = vmatprep.subr.bf16.mxu1 %v6454_v33 }
 0x2c0   : > { %5715 = vmatpush3.bf16.msra.mxu0 %v6259_v11 }
 0x2c1   : > { %5716 = vmatprep.subr.bf16.mxu0 %v6454_v33 }
 0x2c2   : > { %5735 = vmatpush3.bf16.msra.mxu1 %v6260_v12 }
 0x2c3   : > { %5736 = vmatprep.subr.bf16.mxu1 %v6454_v33 }
 0x2c4   : > { %5717 = vmatpush3.bf16.msra.mxu0 %v6261_v14 }
 0x2c5   : > { %5718 = vmatprep.subr.bf16.mxu0 %v6454_v33 }
 0x2c6   : > { %5737 = vmatpush3.bf16.msra.mxu1 %v6262_v15 }
 0x2c7   : > { %5738 = vmatprep.subr.bf16.mxu1 %v6454_v33 }
 0x2c8   : > { %5719 = vmatpush3.bf16.msra.mxu0 %v6263_v17 }
 0x2c9   : > { %5720 = vmatprep.subr.bf16.mxu0 %v6454_v33 }
 0x2ca   : > { %5739 = vmatpush3.bf16.msra.mxu1 %v6264_v18 }
 0x2cb   : > { %5740 = vmatprep.subr.bf16.mxu1 %v6454_v33 }
 0x2cc   : > { %5721 = vmatpush3.bf16.msra.mxu0 %v6265_v20 }
 0x2cd   : > { %5722 = vmatprep.subr.bf16.mxu0 %v6454_v33 }
 0x2ce   : > { %5741 = vmatpush3.bf16.msra.mxu1 %v6266_v21 }
 0x2cf   : > { %5742 = vmatprep.subr.bf16.mxu1 %v6454_v33 }
 0x2d0   : > { %5723 = vmatpush3.bf16.msra.mxu0 %v6267_v23 }
 0x2d1   : > { %5748 = vmatprep.subr.bf16.mxu0 %v6454_v33 }
 0x2d2   : > { %5743 = vmatpush3.bf16.msra.mxu1 %v6268_v24 }
 0x2d3   : > { %5725 = vmatmul.mubr.bf16.vlgmr.msra.gmra.mxu0 %v1046_v27  ;;  %v1165_v31 = vpop.f32.mrf.mxu0  ;;  %5768 = vmatprep.subr.bf16.mxu1 %v6454_v33 }
 0x2d4   : > { %5749 = vmatpush3.bf16.msra.mxu0 %v6269_v26  ;;  %5764 = vmatprep.mubr.msk.bf16.mxu0 %vm6455_vm2, %v6454_v33 }
 0x2d5   : > { %5745 = vmatmul.mubr.bf16.vlgmr.msra.gmra.mxu1 %v1047_v29  ;;  %v5486_v34 = vpop.f32.mrf.mxu0  ;;  %v1254_v35 = vpop.f32.mrf.mxu1  ;;  %5750 = vmatprep.subr.bf16.mxu0 %v6454_v33 }
 0x2d6   : > { %v1255_v36 = vadd.f32 %v1254_v35, %v1165_v31  ;;  %5769 = vmatpush3.bf16.msra.mxu1 %v6270_v28  ;;  %5784 = vmatprep.mubr.msk.bf16.mxu1 %vm6455_vm2, %v6454_v33  ;;  %v6289_v35 = vld [vmem:[%s7814_s7 + $0x78] sm:$0xff]  }
 0x2d7   : > { %v1168_v38 = vpop.f32.mrf.mxu0  ;;  %v5506_v40 = vpop.f32.mrf.mxu1  ;;  %5770 = vmatprep.subr.bf16.mxu1 %v6454_v33 }
 0x2d8   : > { %5751 = vmatpush3.bf16.msra.mxu0 %v6271_v32  ;;  %v6291_v40 = vld [vmem:[%s7814_s7 + $0x70] sm:$0xff]  }
 0x2d9   : > { %v5487_v42 = vpop.f32.mrf.mxu0  ;;  %v1257_v43 = vpop.f32.mrf.mxu1  ;;  %5752 = vmatprep.subr.bf16.mxu0 %v6454_v33 }
 0x2da   : > { %v1258_v44 = vadd.f32 %v1257_v43, %v1168_v38  ;;  %5771 = vmatpush3.bf16.msra.mxu1 %v6272_v37 }
 0x2db   : > { %v5507_v47 = vpop.f32.mrf.mxu1  ;;  %5772 = vmatprep.subr.bf16.mxu1 %v6454_v33 }
 0x2dc   : > { %5753 = vmatpush3.bf16.msra.mxu0 %v6273_v41  ;;  %v6293_v47 = vld [vmem:[%s7814_s7 + $0x68] sm:$0xff]  }
 0x2dd   : > { %5754 = vmatprep.subr.bf16.mxu0 %v6454_v33 }
 0x2de   : > { %5773 = vmatpush3.bf16.msra.mxu1 %v6274_v46 }
 0x2df   : > { %5774 = vmatprep.subr.bf16.mxu1 %v6454_v33 }
 0x2e0   : > { %5755 = vmatpush3.bf16.msra.mxu0 %v6275_v49  ;;  %v6295_v49 = vld [vmem:[%s7814_s7 + $0x60] sm:$0xff]  }
 0x2e1   : > { %5756 = vmatprep.subr.bf16.mxu0 %v6454_v33 }
 0x2e2   : > { %5775 = vmatpush3.bf16.msra.mxu1 %v6276_v50  ;;  %v6297_v50 = vld [vmem:[%s7814_s7 + $0x58] sm:$0xff]  }
 0x2e3   : > { %5776 = vmatprep.subr.bf16.mxu1 %v6454_v33 }
 0x2e4   : > { %5757 = vmatpush3.bf16.msra.mxu0 %v6277_v51  ;;  %v6299_v51 = vld [vmem:[%s7814_s7 + $0x50] sm:$0xff]  }
 0x2e5   : > { %5758 = vmatprep.subr.bf16.mxu0 %v6454_v33 }
 0x2e6   : > { %5777 = vmatpush3.bf16.msra.mxu1 %v6278_v53 }
 0x2e7   : > { %5778 = vmatprep.subr.bf16.mxu1 %v6454_v33 }
 0x2e8   : > { %5759 = vmatpush3.bf16.msra.mxu0 %v6279_v54 }
 0x2e9   : > { %5760 = vmatprep.subr.bf16.mxu0 %v6454_v33 }
 0x2ea   : > { %5779 = vmatpush3.bf16.msra.mxu1 %v6280_v55 }
 0x2eb   : > { %5780 = vmatprep.subr.bf16.mxu1 %v6454_v33 }
 0x2ec   : > { %5761 = vmatpush3.bf16.msra.mxu0 %v6281_v56 }
 0x2ed   : > { %5762 = vmatprep.subr.bf16.mxu0 %v6454_v33 }
 0x2ee   : > { %5781 = vmatpush3.bf16.msra.mxu1 %v6282_v45 }
 0x2ef   : > { %5782 = vmatprep.subr.bf16.mxu1 %v6454_v33 }
 0x2f0   : > { %5763 = vmatpush3.bf16.msra.mxu0 %v6283_v39 }
 0x2f1   : > { %5788 = vmatprep.subr.bf16.mxu0 %v6454_v33 }
 0x2f2   : > { %5783 = vmatpush3.bf16.msra.mxu1 %v6284_v48 }
 0x2f3   : > { %v1360_v58 = vpop.f32.mrf.mxu0  ;;  %5765 = vmatmul.mubr.bf16.vlgmr.msra.gmra.mxu0 %v1048_v57  ;;  %5802 = vmatprep.subr.bf16.mxu1 %v6454_v33 }
 0x2f4   : > { %v1367_v59 = vadd.f32 %v1360_v58, %v1255_v36  ;;  %5790 = vmatprep.mubr.msk.bf16.mxu0 %vm6455_vm2, %v6454_v33 }
 0x2f5   : > { %v5526_v60 = vpop.f32.mrf.mxu0  ;;  %v1468_v61 = vpop.f32.mrf.mxu1  ;;  %5785 = vmatmul.mubr.bf16.vlgmr.msra.gmra.mxu1 %v1049_v52 }
 0x2f6   : > { %v1475_v62 = vadd.f32 %v1468_v61, %v1367_v59  ;;  %5818 = vmatprep.mubr.msk.bf16.mxu1 %vm6455_vm2, %v6454_v33  ;;  %5803 = vmatpush3.bf16.msra.mxu1 %v6289_v35  ;;  %v6296_v35 = vld [vmem:[%s7814_s7 + $0x18] sm:$0xff]  }
 0x2f7   : > { %v1363_v63 = vpop.f32.mrf.mxu0  ;;  %v5546_v0 = vpop.f32.mrf.mxu1  ;;  %5804 = vmatprep.subr.bf16.mxu1 %v6454_v33 }
 0x2f8   : > { %v1368_v1 = vadd.f32 %v1363_v63, %v1258_v44 }
 0x2f9   : > { %v5527_v2 = vpop.f32.mrf.mxu0  ;;  %v1471_v3 = vpop.f32.mrf.mxu1 }
 0x2fa   : > { %v1476_v4 = vadd.f32 %v1471_v3, %v1368_v1  ;;  %5805 = vmatpush3.bf16.msra.mxu1 %v6291_v40  ;;  %v6302_v40 = vld [vmem:[%s7814_s7] sm:$0xff]  }
 0x2fb   : > { %v5547_v5 = vpop.f32.mrf.mxu1  ;;  %5806 = vmatprep.subr.bf16.mxu1 %v6454_v33 }
 0x2fe   : > { %5807 = vmatpush3.bf16.msra.mxu1 %v6293_v47 }
 0x2ff   : > { %5808 = vmatprep.subr.bf16.mxu1 %v6454_v33 }
 0x302   : > { %5809 = vmatpush3.bf16.msra.mxu1 %v6295_v49 }
 0x303   : > { %5810 = vmatprep.subr.bf16.mxu1 %v6454_v33 }
 0x306   : > { %5811 = vmatpush3.bf16.msra.mxu1 %v6297_v50  ;;  %v6305_v50 = vld [vmem:[%s7814_s7 + $0xb8] sm:$0xff]  }
 0x307   : > { %5812 = vmatprep.subr.bf16.mxu1 %v6454_v33 }
 0x30a   : > { %5813 = vmatpush3.bf16.msra.mxu1 %v6299_v51 }
 0x30b   : > { %5814 = vmatprep.subr.bf16.mxu1 %v6454_v33 }
 0x313   : > { %v1576_v6 = vpop.f32.mrf.mxu0 }
 0x314   : > { %v1583_v7 = vadd.f32 %v1576_v6, %v1475_v62 }
 0x315   : > { %v5566_v8 = vpop.f32.mrf.mxu0  ;;  %v1684_v9 = vpop.f32.mrf.mxu1 }
 0x316   : > { %v1691_v10 = vadd.f32 %v1684_v9, %v1583_v7 }
 0x317   : > { %v1579_v11 = vpop.f32.mrf.mxu0  ;;  %v5586_v12 = vpop.f32.mrf.mxu1 }
 0x318   : > { %v1584_v13 = vadd.f32 %v1579_v11, %v1476_v4 }
 0x319   : > { %v5567_v14 = vpop.f32.mrf.mxu0  ;;  %v1687_v15 = vpop.f32.mrf.mxu1 }
 0x31a   : > { %v1692_v16 = vadd.f32 %v1687_v15, %v1584_v13  ;;  %v4785_v14 = vld [vmem:[%s7812_s5] ss:$0 sm:$0xff] }
 0x31b   : > { %v5587_v17 = vpop.f32.mrf.mxu1 }
 0x333   : > { %v1792_v18 = vpop.f32.mrf.mxu0 }
 0x334   : > { %v1799_v19 = vadd.f32 %v1792_v18, %v1691_v10 }
 0x335   : > { %v5606_v20 = vpop.f32.mrf.mxu0  ;;  %v1900_v21 = vpop.f32.mrf.mxu1 }
 0x336   : > { %v1907_v22 = vadd.f32 %v1900_v21, %v1799_v19 }
 0x337   : > { %v1795_v23 = vpop.f32.mrf.mxu0  ;;  %v5626_v24 = vpop.f32.mrf.mxu1 }
 0x338   : > { %v1800_v25 = vadd.f32 %v1795_v23, %v1692_v16 }
 0x339   : > { %v5607_v26 = vpop.f32.mrf.mxu0  ;;  %v1903_v27 = vpop.f32.mrf.mxu1 }
 0x33a   : > { %v1908_v28 = vadd.f32 %v1903_v27, %v1800_v25  ;;  %v6285_v27 = vld [vmem:[%s7813_s6] sm:$0xff]  }
 0x33b   : > { %v5627_v29 = vpop.f32.mrf.mxu1 }
 0x33c   : > { %v6290_v29 = vld [vmem:[%s7814_s7 + $0x30] sm:$0xff]  }
 0x353   : > { %v2008_v30 = vpop.f32.mrf.mxu0 }
 0x354   : > { %v2015_v31 = vadd.f32 %v2008_v30, %v1907_v22  ;;  %v6286_v30 = vld [vmem:[%s7813_s6 + $0x8] sm:$0xff]  }
 0x355   : > { %v5646_v32 = vpop.f32.mrf.mxu0  ;;  %v2116_v34 = vpop.f32.mrf.mxu1 }
 0x356   : > { %v2123_v36 = vadd.f32 %v2116_v34, %v2015_v31  ;;  %v6292_v31 = vld [vmem:[%s7814_s7 + $0x28] sm:$0xff]   ;;  %v6294_v32 = vld [vmem:[%s7814_s7 + $0x20] sm:$0xff]   ;;  %v6287_v34 = vld [vmem:[%s7813_s6 + $0x10] ss:$0 sps:$4 sm:$0x33]  }
 0x357   : > { %v2011_v37 = vpop.f32.mrf.mxu0  ;;  %v5666_v38 = vpop.f32.mrf.mxu1 }
 0x358   : > { %v2016_v41 = vadd.f32 %v2011_v37, %v1908_v28  ;;  %v6288_v28 = vld [vmem:[%s7814_s7 + $0x38] sm:$0xff]   ;;  %v6300_v37 = vld [vmem:[%s7814_s7 + $0x8] sm:$0xff]  }
 0x359   : > { %v5647_v42 = vpop.f32.mrf.mxu0  ;;  %v2119_v43 = vpop.f32.mrf.mxu1  ;;  %v6301_v38 = vld [vmem:[%s7814_s7 + $0x48] sm:$0xff]  }
 0x35a   : > { %v2124_v44 = vadd.f32 %v2119_v43, %v2016_v41  ;;  %5815 = vmatpush3.bf16.msra.mxu1 %v6301_v38  ;;  %v6303_v41 = vld [vmem:[%s7814_s7 + $0x40] sm:$0xff]   ;;  %v6346_v38 = vld [vmem:[%s7814_s7 + $0x1d0] sm:$0xff]  }
 0x35b   : > { %v5667_v46 = vpop.f32.mrf.mxu1  ;;  %5816 = vmatprep.subr.bf16.mxu1 %v6454_v33 }
 0x35c   : > { %v6304_v46 = vld [vmem:[%s7814_s7 + $0xf8] sm:$0xff]  }
 0x35e   : > { %5817 = vmatpush3.bf16.msra.mxu1 %v6303_v41  ;;  %v6348_v41 = vld [vmem:[%s7814_s7 + $0x1c8] sm:$0xff]  }
 0x35f   : > { %5842 = vmatprep.subr.bf16.mxu1 %v6454_v33 }
 0x373   : > { %v2224_v53 = vpop.f32.mrf.mxu0 }
 0x374   : > { %v2231_v1 = vadd.f32 %v2224_v53, %v2123_v36  ;;  %v6298_v36 = vld [vmem:[%s7814_s7 + $0x10] sm:$0xff]  }
 0x375   : > { %v5686_v54 = vpop.f32.mrf.mxu0  ;;  %v2332_v55 = vpop.f32.mrf.mxu1  ;;  %v6306_v53 = vld [vmem:[%s7814_s7 + $0xf0] sm:$0xff]  }
 0x376   : > { %v2339_v2 = vadd.f32 %v2332_v55, %v2231_v1  ;;  %v6307_v55 = vld [vmem:[%s7814_s7 + $0xb0] sm:$0xff]  }
 0x377   : > { %v2227_v56 = vpop.f32.mrf.mxu0  ;;  %v5706_v45 = vpop.f32.mrf.mxu1  ;;  %v6314_v1 = vld [vmem:[%s7814_s7 + $0xd0] sm:$0xff]  }
 0x378   : > { %v2232_v3 = vadd.f32 %v2227_v56, %v2124_v44  ;;  %v6308_v45 = vld [vmem:[%s7814_s7 + $0xe8] sm:$0xff]  }
 0x379   : > { %v5687_v39 = vpop.f32.mrf.mxu0  ;;  %v2335_v48 = vpop.f32.mrf.mxu1 }
 0x37a   : > { %v2340_v5 = vadd.f32 %v2335_v48, %v2232_v3  ;;  %v6309_v48 = vld [vmem:[%s7814_s7 + $0xa8] sm:$0xff]  }
 0x37b   : > { %v5707_v57 = vpop.f32.mrf.mxu1  ;;  %v6316_v3 = vld [vmem:[%s7814_s7 + $0xc8] sm:$0xff]  }
 0x393   : > { %v2440_v52 = vpop.f32.mrf.mxu0 }
 0x394   : > { %v2447_v4 = vadd.f32 %v2440_v52, %v2339_v2  ;;  %v6310_v52 = vld [vmem:[%s7814_s7 + $0xe0] sm:$0xff]   ;;  %v6315_v2 = vld [vmem:[%s7814_s7 + $0x90] sm:$0xff]  }
 0x395   : > { %v5726_v58 = vpop.f32.mrf.mxu0  ;;  %v2548_v59 = vpop.f32.mrf.mxu1 }
 0x396   : > { %v2555_v6 = vadd.f32 %v2548_v59, %v2447_v4  ;;  %v6311_v59 = vld [vmem:[%s7814_s7 + $0xa0] sm:$0xff]   ;;  %v6317_v4 = vld [vmem:[%s7814_s7 + $0x88] sm:$0xff]  }
 0x397   : > { %v2443_v60 = vpop.f32.mrf.mxu0  ;;  %v5746_v61 = vpop.f32.mrf.mxu1 }
 0x398   : > { %v2448_v7 = vadd.f32 %v2443_v60, %v2340_v5  ;;  %v6312_v61 = vld [vmem:[%s7814_s7 + $0xd8] sm:$0xff]   ;;  %v6318_v5 = vld [vmem:[%s7814_s7 + $0xc0] sm:$0xff]  }
 0x399   : > { %v5727_v62 = vpop.f32.mrf.mxu0  ;;  %v2551_v63 = vpop.f32.mrf.mxu1 }
 0x39a   : > { %v2556_v12 = vadd.f32 %v2551_v63, %v2448_v7  ;;  %v6313_v63 = vld [vmem:[%s7814_s7 + $0x98] sm:$0xff]  }
 0x39b   : > { %v5747_v0 = vpop.f32.mrf.mxu1  ;;  %v6320_v7 = vld [vmem:[%s7814_s7 + $0x178] sm:$0xff]  }
 0x3b3   : > { %v2656_v8 = vpop.f32.mrf.mxu0 }
 0x3b4   : > { %v2663_v9 = vadd.f32 %v2656_v8, %v2555_v6  ;;  %v6319_v6 = vld [vmem:[%s7814_s7 + $0x80] sm:$0xff]  }
 0x3b5   : > { %v5766_v10 = vpop.f32.mrf.mxu0  ;;  %v2764_v11 = vpop.f32.mrf.mxu1 }
 0x3b6   : > { %v2771_v13 = vadd.f32 %v2764_v11, %v2663_v9  ;;  %v6321_v9 = vld [vmem:[%s7814_s7 + $0x138] sm:$0xff]   ;;  %v6322_v11 = vld [vmem:[%s7814_s7 + $0x170] sm:$0xff]  }
 0x3b7   : > { %v2659_v15 = vpop.f32.mrf.mxu0  ;;  %v5786_v16 = vpop.f32.mrf.mxu1 }
 0x3b8   : > { %v2664_v17 = vadd.f32 %v2659_v15, %v2556_v12  ;;  %v2780_v20 = vadd.f32 %v4785_v14, %v2771_v13  ;;  %v6323_v12 = vld [vmem:[%s7814_s7 + $0x130] sm:$0xff]   ;;  %v6324_v13 = vld [vmem:[%s7814_s7 + $0x168] sm:$0xff]   ;;  %v6326_v15 = vld [vmem:[%s7814_s7 + $0x160] sm:$0xff]  }
 0x3b9   : > { %v5767_v18 = vpop.f32.mrf.mxu0  ;;  %v2767_v19 = vpop.f32.mrf.mxu1  ;;  %v6327_v16 = vld [vmem:[%s7814_s7 + $0x120] sm:$0xff]  }
 0x3ba   : > { %v2772_v21 = vadd.f32 %v2767_v19, %v2664_v17  ;;  %v2782_v24 = vmax.f32 %v2780_v20, 0.0  ;;  %v6328_v17 = vld [vmem:[%s7814_s7 + $0x158] sm:$0xff]   ;;  %v6330_v19 = vld [vmem:[%s7814_s7 + $0x150] sm:$0xff]  }
 0x3bb   : > { %v5787_v22 = vpop.f32.mrf.mxu1  ;;  %v6329_v18 = vld [vmem:[%s7814_s7 + $0x118] sm:$0xff]   ;;  %v6331_v20 = vld [vmem:[%s7814_s7 + $0x110] sm:$0xff]  }
 0x3bc   : > { %v2781_v23 = vadd.f32 %v4785_v14, %v2772_v21  ;;  %v6325_v14 = vld [vmem:[%s7814_s7 + $0x128] sm:$0xff]  }
 0x3bd   : > { %v6332_v21 = vld [vmem:[%s7814_s7 + $0x148] sm:$0xff]  }
 0x3be   : > { %v2783_v25 = vmax.f32 %v2781_v23, 0.0  ;;  %v6333_v22 = vld [vmem:[%s7814_s7 + $0x108] sm:$0xff]  }
 0x3c0   : > { %v2784_v26 = vpack.c.bf16 %v2783_v25, %v2782_v24  ;;  %v6334_v24 = vld [vmem:[%s7814_s7 + $0x140] sm:$0xff]  }
 0x3c1   : > { %v6335_v25 = vld [vmem:[%s7814_s7 + $0x100] sm:$0xff]  }
 0x3c2   : > { %5789 = vmatpush3.bf16.msra.mxu0 %v2784_v26 }
 0x3c3   : > { %5822 = vmatprep.subr.bf16.mxu0 %v6454_v33 }
 0x3c5   : > { %5791 = vmatmul.mubr.msk.bf16.vlgmr.msra.gmra.mxu0 %vm2803_vm3, %v6285_v27  ;;  %v6336_v27 = vld [vmem:[%s7814_s7 + $0x1f8] sm:$0xff]  }
 0x3c6   : > { %5794 = vmatprep.mubr.msk.bf16.mxu0 %vm6455_vm2, %v6454_v33  ;;  %5823 = vmatpush3.bf16.msra.mxu0 %v6288_v28  ;;  %v6337_v28 = vld [vmem:[%s7814_s7 + $0x1b8] sm:$0xff]  }
 0x3c7   : > { %5824 = vmatprep.subr.bf16.mxu0 %v6454_v33 }
 0x3ca   : > { %5825 = vmatpush3.bf16.msra.mxu0 %v6290_v29  ;;  %v6338_v29 = vld [vmem:[%s7814_s7 + $0x1f0] sm:$0xff]  }
 0x3cb   : > { %5826 = vmatprep.subr.bf16.mxu0 %v6454_v33 }
 0x3cd   : > { %5795 = vmatmul.mubr.msk.bf16.gmra.mxu0 %vm2803_vm3, %v6286_v30  ;;  %v6339_v30 = vld [vmem:[%s7814_s7 + $0x1b0] sm:$0xff]  }
 0x3ce   : > { %5798 = vmatprep.mubr.msk.bf16.mxu0 %vm6455_vm2, %v6454_v33  ;;  %5827 = vmatpush3.bf16.msra.mxu0 %v6292_v31  ;;  %v6340_v31 = vld [vmem:[%s7814_s7 + $0x1e8] sm:$0xff]  }
 0x3cf   : > { %5828 = vmatprep.subr.bf16.mxu0 %v6454_v33 }
 0x3d2   : > { %5829 = vmatpush3.bf16.msra.mxu0 %v6294_v32  ;;  %v6341_v32 = vld [vmem:[%s7814_s7 + $0x1a8] sm:$0xff]  }
 0x3d3   : > { %5830 = vmatprep.subr.bf16.mxu0 %v6454_v33 }
 0x3d5   : > { %5799 = vmatmul.mubr.msk.bf16.gmra.mxu0 %vm2803_vm3, %v6287_v34  ;;  %v6342_v34 = vld [vmem:[%s7814_s7 + $0x1e0] sm:$0xff]  }
 0x3d6   : > { %5831 = vmatpush3.bf16.msra.mxu0 %v6296_v35  ;;  %5838 = vmatprep.mubr.msk.bf16.mxu0 %vm6455_vm2, %v6454_v33  ;;  %v6343_v35 = vld [vmem:[%s7814_s7 + $0x1a0] sm:$0xff]  }
 0x3d7   : > { %5832 = vmatprep.subr.bf16.mxu0 %v6454_v33 }
 0x3da   : > { %5833 = vmatpush3.bf16.msra.mxu0 %v6298_v36  ;;  %v6344_v36 = vld [vmem:[%s7814_s7 + $0x1d8] sm:$0xff]  }
 0x3db   : > { %5834 = vmatprep.subr.bf16.mxu0 %v6454_v33 }
 0x3de   : > { %5835 = vmatpush3.bf16.msra.mxu0 %v6300_v37  ;;  %v6345_v37 = vld [vmem:[%s7814_s7 + $0x198] sm:$0xff]  }
 0x3df   : > { %5836 = vmatprep.subr.bf16.mxu0 %v6454_v33 }
 0x3e2   : > { %5837 = vmatpush3.bf16.msra.mxu0 %v6302_v40  ;;  %v6347_v40 = vld [vmem:[%s7814_s7 + $0x190] sm:$0xff]  }
 0x3e3   : > { %5862 = vmatprep.subr.bf16.mxu0 %v6454_v33 }
 0x485   : > { %v2847_v42 = vpop.f32.mrf.mxu0 }
 0x487   : > { %v5792_v43 = vpop.f32.mrf.mxu0 }
 0x488   : > { %v6350_v43 = vld [vmem:[%s7814_s7 + $0x1c0] sm:$0xff]  }
 0x489   : > { %v2850_v44 = vpop.f32.mrf.mxu0 }
 0x48a   : > { %v7376_v47 = vpack.c.bf16 %v2850_v44, %v2847_v42  ;;  %v6349_v42 = vld [vmem:[%s7814_s7 + $0x188] sm:$0xff]   ;;  %v6351_v44 = vld [vmem:[%s7814_s7 + $0x180] sm:$0xff]  }
 0x48b   : > { %v5793_v49 = vpop.f32.mrf.mxu0 }
 0x48c   : > { %5839 = vmatmul.mubr.bf16.vlgmr.msra.gmra.mxu0 %v7376_v47  ;;  %v2906_v51 = vrot.slane %v7376_v47, 2  ;;  %v3209_v8 = vrot.slane %v7376_v47, 6  ;;  %v3101_v10 = vrot.slane %v7376_v47, 4  ;;  %v6352_v47 = vld [vmem:[%s7814_s7 + $0x238] sm:$0xff]  }
 0x48d   : > { %5863 = vmatpush3.bf16.msra.mxu0 %v6304_v46  ;;  %5878 = vmatprep.mubr.msk.bf16.mxu0 %vm6455_vm2, %v6454_v33  ;;  %v7388_v54 = vpop.f32.mrf.mxu0 }
 0x48e   : > { %5819 = vmatmul.mubr.bf16.vlgmr.msra.gmra.mxu1 %v2906_v51  ;;  %5864 = vmatprep.subr.bf16.mxu0 %v6454_v33  ;;  %v6354_v51 = vld [vmem:[%s7814_s7 + $0x228] sm:$0xff]  }
 0x48f   : > { %5843 = vmatpush3.bf16.msra.mxu1 %v6305_v50  ;;  %5858 = vmatprep.mubr.msk.bf16.mxu1 %vm6455_vm2, %v6454_v33  ;;  %v5796_v56 = vpop.f32.mrf.mxu0  ;;  %v6353_v50 = vld [vmem:[%s7814_s7 + $0x230] sm:$0xff]  }
 0x490   : > { %5844 = vmatprep.subr.bf16.mxu1 %v6454_v33  ;;  %v6358_v56 = vld [vmem:[%s7814_s7 + $0x208] sm:$0xff]  }
 0x491   : > { %5865 = vmatpush3.bf16.msra.mxu0 %v6306_v53  ;;  %v7400_v39 = vpop.f32.mrf.mxu0  ;;  %v6355_v53 = vld [vmem:[%s7814_s7 + $0x220] sm:$0xff]  }
 0x492   : > { %5866 = vmatprep.subr.bf16.mxu0 %v6454_v33  ;;  %v7513_v23 = vpack.c.bf16 %v7400_v39, %v7388_v54  ;;  %v6356_v54 = vld [vmem:[%s7814_s7 + $0x218] sm:$0xff]  }
 0x493   : > { %5845 = vmatpush3.bf16.msra.mxu1 %v6307_v55  ;;  %v5797_v57 = vpop.f32.mrf.mxu0  ;;  %v6357_v55 = vld [vmem:[%s7814_s7 + $0x210] sm:$0xff]  }
 0x494   : > { %5846 = vmatprep.subr.bf16.mxu1 %v6454_v33  ;;  %v3424_v26 = vrot.slane %v7513_v23, 2  ;;  %v3640_v46 = vrot.slane %v7513_v23, 6  ;;  %v3532_v49 = vrot.slane %v7513_v23, 4  ;;  %v6361_v57 = vld [vmem:[%s7816_s9 + $0x78] sm:$0xff]  }
 0x495   : > { %5867 = vmatpush3.bf16.msra.mxu0 %v6308_v45  ;;  %v7410_v58 = vpop.f32.mrf.mxu0  ;;  %v6359_v45 = vld [vmem:[%s7814_s7 + $0x200] sm:$0xff]  }
 0x496   : > { %5868 = vmatprep.subr.bf16.mxu0 %v6454_v33  ;;  %v2871_v39 = vpack.c.bf16 %v7410_v58, %v7410_v58  ;;  %v6363_v58 = vld [vmem:[%s7816_s9 + $0x70] sm:$0xff]  }
 0x497   : > { %5847 = vmatpush3.bf16.msra.mxu1 %v6309_v48  ;;  %v5800_v60 = vpop.f32.mrf.mxu0  ;;  %v6360_v48 = vld [vmem:[%s7816_s9 + $0x38] sm:$0xff]  }
 0x498   : > { %5848 = vmatprep.subr.bf16.mxu1 %v6454_v33  ;;  %v6365_v60 = vld [vmem:[%s7816_s9 + $0x68] sm:$0xff]  }
 0x499   : > { %5869 = vmatpush3.bf16.msra.mxu0 %v6310_v52  ;;  %v2866_v62 = vpop.f32.mrf.mxu0  ;;  %v6362_v52 = vld [vmem:[%s7816_s9 + $0x30] sm:$0xff]  }
 0x49a   : > { %5870 = vmatprep.subr.bf16.mxu0 %v6454_v33  ;;  %v6367_v62 = vld [vmem:[%s7816_s9 + $0x60] sm:$0xff]  }
 0x49b   : > { %5849 = vmatpush3.bf16.msra.mxu1 %v6311_v59  ;;  %v5801_v0 = vpop.f32.mrf.mxu0  ;;  %v6364_v59 = vld [vmem:[%s7816_s9 + $0x28] sm:$0xff]  }
 0x49c   : > { %5850 = vmatprep.subr.bf16.mxu1 %v6454_v33  ;;  %v6369_v0 = vld [vmem:[%s7816_s9 + $0x58] sm:$0xff]  }
 0x49d   : > { %5871 = vmatpush3.bf16.msra.mxu0 %v6312_v61  ;;  %v6366_v61 = vld [vmem:[%s7816_s9 + $0x20] sm:$0xff]  }
 0x49e   : > { %5872 = vmatprep.subr.bf16.mxu0 %v6454_v33 }
 0x49f   : > { %5851 = vmatpush3.bf16.msra.mxu1 %v6313_v63  ;;  %v6368_v63 = vld [vmem:[%s7816_s9 + $0x18] sm:$0xff]  }
 0x4a0   : > { %5852 = vmatprep.subr.bf16.mxu1 %v6454_v33 }
 0x4a1   : > { %5873 = vmatpush3.bf16.msra.mxu0 %v6314_v1  ;;  %v6370_v1 = vld [vmem:[%s7816_s9 + $0x10] sm:$0xff]  }
 0x4a2   : > { %5874 = vmatprep.subr.bf16.mxu0 %v6454_v33 }
 0x4a3   : > { %5853 = vmatpush3.bf16.msra.mxu1 %v6315_v2  ;;  %v6371_v2 = vld [vmem:[%s7816_s9 + $0x50] sm:$0xff]  }
 0x4a4   : > { %5854 = vmatprep.subr.bf16.mxu1 %v6454_v33 }
 0x4a5   : > { %5875 = vmatpush3.bf16.msra.mxu0 %v6316_v3 }
 0x4a6   : > { %5876 = vmatprep.subr.bf16.mxu0 %v6454_v33 }
 0x4a7   : > { %5855 = vmatpush3.bf16.msra.mxu1 %v6317_v4  ;;  %v6372_v4 = vld [vmem:[%s7816_s9 + $0x8] sm:$0xff]  }
 0x4a8   : > { %5856 = vmatprep.subr.bf16.mxu1 %v6454_v33 }
 0x4a9   : > { %5877 = vmatpush3.bf16.msra.mxu0 %v6318_v5 }
 0x4aa   : > { %5902 = vmatprep.subr.bf16.mxu0 %v6454_v33 }
 0x4ab   : > { %5857 = vmatpush3.bf16.msra.mxu1 %v6319_v6 }
 0x4ac   : > { %5879 = vmatmul.mubr.bf16.vlgmr.msra.gmra.mxu0 %v3209_v8  ;;  %5882 = vmatprep.subr.bf16.mxu1 %v6454_v33  ;;  %v6373_v8 = vld [vmem:[%s7816_s9 + $0x48] sm:$0xff]  }
 0x4ad   : > { %5903 = vmatpush3.bf16.msra.mxu0 %v6320_v7  ;;  %5918 = vmatprep.mubr.msk.bf16.mxu0 %vm6455_vm2, %v6454_v33 }
 0x4ae   : > { %5859 = vmatmul.mubr.bf16.vlgmr.msra.gmra.mxu1 %v3101_v10  ;;  %5904 = vmatprep.subr.bf16.mxu0 %v6454_v33 }
 0x4af   : > { %5883 = vmatpush3.bf16.msra.mxu1 %v6321_v9  ;;  %5898 = vmatprep.mubr.msk.bf16.mxu1 %vm6455_vm2, %v6454_v33 }
 0x4b0   : > { %5884 = vmatprep.subr.bf16.mxu1 %v6454_v33 }
 0x4b1   : > { %5905 = vmatpush3.bf16.msra.mxu0 %v6322_v11  ;;  %v6374_v11 = vld [vmem:[%s7816_s9] sm:$0xff]  }
 0x4b2   : > { %5906 = vmatprep.subr.bf16.mxu0 %v6454_v33 }
 0x4b3   : > { %5885 = vmatpush3.bf16.msra.mxu1 %v6323_v12 }
 0x4b4   : > { %5886 = vmatprep.subr.bf16.mxu1 %v6454_v33 }
 0x4b5   : > { %5907 = vmatpush3.bf16.msra.mxu0 %v6324_v13 }
 0x4b6   : > { %5908 = vmatprep.subr.bf16.mxu0 %v6454_v33 }
 0x4b7   : > { %5887 = vmatpush3.bf16.msra.mxu1 %v6325_v14  ;;  %v6375_v14 = vld [vmem:[%s7816_s9 + $0x40] sm:$0xff]  }
 0x4b8   : > { %5888 = vmatprep.subr.bf16.mxu1 %v6454_v33 }
 0x4b9   : > { %5909 = vmatpush3.bf16.msra.mxu0 %v6326_v15 }
 0x4ba   : > { %5910 = vmatprep.subr.bf16.mxu0 %v6454_v33 }
 0x4bb   : > { %5889 = vmatpush3.bf16.msra.mxu1 %v6327_v16 }
 0x4bc   : > { %5890 = vmatprep.subr.bf16.mxu1 %v6454_v33 }
 0x4bd   : > { %5911 = vmatpush3.bf16.msra.mxu0 %v6328_v17 }
 0x4be   : > { %5912 = vmatprep.subr.bf16.mxu0 %v6454_v33 }
 0x4bf   : > { %5891 = vmatpush3.bf16.msra.mxu1 %v6329_v18 }
 0x4c0   : > { %5892 = vmatprep.subr.bf16.mxu1 %v6454_v33 }
 0x4c1   : > { %5913 = vmatpush3.bf16.msra.mxu0 %v6330_v19 }
 0x4c2   : > { %5914 = vmatprep.subr.bf16.mxu0 %v6454_v33 }
 0x4c3   : > { %5893 = vmatpush3.bf16.msra.mxu1 %v6331_v20 }
 0x4c4   : > { %5894 = vmatprep.subr.bf16.mxu1 %v6454_v33 }
 0x4c5   : > { %5915 = vmatpush3.bf16.msra.mxu0 %v6332_v21 }
 0x4c6   : > { %5916 = vmatprep.subr.bf16.mxu0 %v6454_v33 }
 0x4c7   : > { %5895 = vmatpush3.bf16.msra.mxu1 %v6333_v22 }
 0x4c8   : > { %5896 = vmatprep.subr.bf16.mxu1 %v6454_v33 }
 0x4c9   : > { %5917 = vmatpush3.bf16.msra.mxu0 %v6334_v24 }
 0x4ca   : > { %5942 = vmatprep.subr.bf16.mxu0 %v6454_v33 }
 0x4cb   : > { %5897 = vmatpush3.bf16.msra.mxu1 %v6335_v25 }
 0x4cc   : > { %5919 = vmatmul.mubr.bf16.vlgmr.msra.gmra.mxu0 %v3424_v26  ;;  %5922 = vmatprep.subr.bf16.mxu1 %v6454_v33 }
 0x4cd   : > { %5943 = vmatpush3.bf16.msra.mxu0 %v6336_v27  ;;  %5958 = vmatprep.mubr.msk.bf16.mxu0 %vm6455_vm2, %v6454_v33 }
 0x4ce   : > { %5899 = vmatmul.mubr.bf16.vlgmr.msra.gmra.mxu1 %v7513_v23  ;;  %5944 = vmatprep.subr.bf16.mxu0 %v6454_v33 }
 0x4cf   : > { %5923 = vmatpush3.bf16.msra.mxu1 %v6337_v28  ;;  %5938 = vmatprep.mubr.msk.bf16.mxu1 %vm6455_vm2, %v6454_v33 }
 0x4d0   : > { %5924 = vmatprep.subr.bf16.mxu1 %v6454_v33 }
 0x4d1   : > { %5945 = vmatpush3.bf16.msra.mxu0 %v6338_v29 }
 0x4d2   : > { %5946 = vmatprep.subr.bf16.mxu0 %v6454_v33 }
 0x4d3   : > { %5925 = vmatpush3.bf16.msra.mxu1 %v6339_v30 }
 0x4d4   : > { %5926 = vmatprep.subr.bf16.mxu1 %v6454_v33 }
 0x4d5   : > { %5947 = vmatpush3.bf16.msra.mxu0 %v6340_v31 }
 0x4d6   : > { %5948 = vmatprep.subr.bf16.mxu0 %v6454_v33 }
 0x4d7   : > { %5927 = vmatpush3.bf16.msra.mxu1 %v6341_v32 }
 0x4d8   : > { %5928 = vmatprep.subr.bf16.mxu1 %v6454_v33 }
 0x4d9   : > { %5949 = vmatpush3.bf16.msra.mxu0 %v6342_v34 }
 0x4da   : > { %5950 = vmatprep.subr.bf16.mxu0 %v6454_v33 }
 0x4db   : > { %5929 = vmatpush3.bf16.msra.mxu1 %v6343_v35 }
 0x4dc   : > { %5930 = vmatprep.subr.bf16.mxu1 %v6454_v33 }
 0x4dd   : > { %5951 = vmatpush3.bf16.msra.mxu0 %v6344_v36 }
 0x4de   : > { %5952 = vmatprep.subr.bf16.mxu0 %v6454_v33 }
 0x4df   : > { %5931 = vmatpush3.bf16.msra.mxu1 %v6345_v37 }
 0x4e0   : > { %5932 = vmatprep.subr.bf16.mxu1 %v6454_v33 }
 0x4e1   : > { %5953 = vmatpush3.bf16.msra.mxu0 %v6346_v38 }
 0x4e2   : > { %5954 = vmatprep.subr.bf16.mxu0 %v6454_v33 }
 0x4e3   : > { %5933 = vmatpush3.bf16.msra.mxu1 %v6347_v40 }
 0x4e4   : > { %5934 = vmatprep.subr.bf16.mxu1 %v6454_v33 }
 0x4e5   : > { %5955 = vmatpush3.bf16.msra.mxu0 %v6348_v41 }
 0x4e6   : > { %5956 = vmatprep.subr.bf16.mxu0 %v6454_v33 }
 0x4e7   : > { %5935 = vmatpush3.bf16.msra.mxu1 %v6349_v42 }
 0x4e8   : > { %5936 = vmatprep.subr.bf16.mxu1 %v6454_v33 }
 0x4e9   : > { %5957 = vmatpush3.bf16.msra.mxu0 %v6350_v43 }
 0x4ea   : > { %5982 = vmatprep.subr.bf16.mxu0 %v6454_v33 }
 0x4eb   : > { %5937 = vmatpush3.bf16.msra.mxu1 %v6351_v44 }
 0x4ec   : > { %5959 = vmatmul.mubr.bf16.vlgmr.msra.gmra.mxu0 %v3640_v46  ;;  %5962 = vmatprep.subr.bf16.mxu1 %v6454_v33 }
 0x4ed   : > { %5998 = vmatprep.mubr.msk.bf16.mxu0 %vm6455_vm2, %v6454_v33  ;;  %5983 = vmatpush3.bf16.msra.mxu0 %v6361_v57 }
 0x4ee   : > { %5939 = vmatmul.mubr.bf16.vlgmr.msra.gmra.mxu1 %v3532_v49  ;;  %5984 = vmatprep.subr.bf16.mxu0 %v6454_v33 }
 0x4ef   : > { %5963 = vmatpush3.bf16.msra.mxu1 %v6352_v47  ;;  %5978 = vmatprep.mubr.msk.bf16.mxu1 %vm6455_vm2, %v6454_v33 }
 0x4f0   : > { %5964 = vmatprep.subr.bf16.mxu1 %v6454_v33 }
 0x4f1   : > { %5985 = vmatpush3.bf16.msra.mxu0 %v6363_v58 }
 0x4f2   : > { %5986 = vmatprep.subr.bf16.mxu0 %v6454_v33 }
 0x4f3   : > { %5965 = vmatpush3.bf16.msra.mxu1 %v6353_v50 }
 0x4f4   : > { %5966 = vmatprep.subr.bf16.mxu1 %v6454_v33 }
 0x4f5   : > { %5987 = vmatpush3.bf16.msra.mxu0 %v6365_v60  ;;  %v6379_v60 = vld [vmem:[%s7816_s9 + $0xb0] sm:$0xff]  }
 0x4f6   : > { %5988 = vmatprep.subr.bf16.mxu0 %v6454_v33 }
 0x4f7   : > { %5967 = vmatpush3.bf16.msra.mxu1 %v6354_v51  ;;  %v4992_v51 = vld [vmem:[%s7815_s8] ss:$0 sm:$0xff] }
 0x4f8   : > { %5968 = vmatprep.subr.bf16.mxu1 %v6454_v33 }
 0x4f9   : > { %5989 = vmatpush3.bf16.msra.mxu0 %v6367_v62  ;;  %v6381_v62 = vld [vmem:[%s7816_s9 + $0xa8] sm:$0xff]  }
 0x4fa   : > { %5990 = vmatprep.subr.bf16.mxu0 %v6454_v33 }
 0x4fb   : > { %5969 = vmatpush3.bf16.msra.mxu1 %v6355_v53 }
 0x4fc   : > { %5970 = vmatprep.subr.bf16.mxu1 %v6454_v33 }
 0x4fd   : > { %5991 = vmatpush3.bf16.msra.mxu0 %v6369_v0  ;;  %v6383_v0 = vld [vmem:[%s7816_s9 + $0xa0] sm:$0xff]  }
 0x4fe   : > { %5992 = vmatprep.subr.bf16.mxu0 %v6454_v33 }
 0x4ff   : > { %5971 = vmatpush3.bf16.msra.mxu1 %v6356_v54 }
 0x500   : > { %5972 = vmatprep.subr.bf16.mxu1 %v6454_v33 }
 0x501   : > { %5993 = vmatpush3.bf16.msra.mxu0 %v6371_v2  ;;  %v6385_v2 = vld [vmem:[%s7816_s9 + $0x98] sm:$0xff]  }
 0x502   : > { %5994 = vmatprep.subr.bf16.mxu0 %v6454_v33 }
 0x503   : > { %5973 = vmatpush3.bf16.msra.mxu1 %v6357_v55 }
 0x504   : > { %5974 = vmatprep.subr.bf16.mxu1 %v6454_v33 }
 0x505   : > { %5995 = vmatpush3.bf16.msra.mxu0 %v6373_v8  ;;  %v6391_v8 = vld [vmem:[%s7816_s9 + $0x80] sm:$0xff]  }
 0x506   : > { %5996 = vmatprep.subr.bf16.mxu0 %v6454_v33 }
 0x507   : > { %5975 = vmatpush3.bf16.msra.mxu1 %v6358_v56 }
 0x508   : > { %5976 = vmatprep.subr.bf16.mxu1 %v6454_v33 }
 0x509   : > { %5997 = vmatpush3.bf16.msra.mxu0 %v6375_v14 }
 0x50a   : > { %6022 = vmatprep.subr.bf16.mxu0 %v6454_v33 }
 0x50b   : > { %5977 = vmatpush3.bf16.msra.mxu1 %v6359_v45 }
 0x50c   : > { %6002 = vmatprep.subr.bf16.mxu1 %v6454_v33 }
 0x50e   : > { %5979 = vmatmul.mubr.bf16.vlgmr.msra.gmra.mxu1 %v2871_v39 }
 0x50f   : > { %6018 = vmatprep.mubr.msk.bf16.mxu1 %vm6455_vm2, %v6454_v33  ;;  %6003 = vmatpush3.bf16.msra.mxu1 %v6360_v48  ;;  %v6376_v48 = vld [vmem:[%s7816_s9 + $0xf8] sm:$0xff]  }
 0x510   : > { %6004 = vmatprep.subr.bf16.mxu1 %v6454_v33 }
 0x513   : > { %6005 = vmatpush3.bf16.msra.mxu1 %v6362_v52  ;;  %v6377_v52 = vld [vmem:[%s7816_s9 + $0xb8] sm:$0xff]  }
 0x514   : > { %6006 = vmatprep.subr.bf16.mxu1 %v6454_v33 }
 0x517   : > { %6007 = vmatpush3.bf16.msra.mxu1 %v6364_v59  ;;  %v6378_v59 = vld [vmem:[%s7816_s9 + $0xf0] sm:$0xff]  }
 0x518   : > { %6008 = vmatprep.subr.bf16.mxu1 %v6454_v33 }
 0x51b   : > { %6009 = vmatpush3.bf16.msra.mxu1 %v6366_v61  ;;  %v6380_v61 = vld [vmem:[%s7816_s9 + $0xe8] sm:$0xff]  }
 0x51c   : > { %6010 = vmatprep.subr.bf16.mxu1 %v6454_v33 }
 0x51f   : > { %6011 = vmatpush3.bf16.msra.mxu1 %v6368_v63  ;;  %v6382_v63 = vld [vmem:[%s7816_s9 + $0xe0] sm:$0xff]  }
 0x520   : > { %6012 = vmatprep.subr.bf16.mxu1 %v6454_v33 }
 0x523   : > { %6013 = vmatpush3.bf16.msra.mxu1 %v6370_v1  ;;  %v6384_v1 = vld [vmem:[%s7816_s9 + $0xd8] sm:$0xff]  }
 0x524   : > { %6014 = vmatprep.subr.bf16.mxu1 %v6454_v33 }
 0x527   : > { %6015 = vmatpush3.bf16.msra.mxu1 %v6372_v4  ;;  %v6387_v4 = vld [vmem:[%s7816_s9 + $0x90] sm:$0xff]  }
 0x528   : > { %6016 = vmatprep.subr.bf16.mxu1 %v6454_v33 }
 0x52b   : > { %6017 = vmatpush3.bf16.msra.mxu1 %v6374_v11 }
 0x52c   : > { %6042 = vmatprep.subr.bf16.mxu1 %v6454_v33 }
 0x54c   : > { %v3078_v3 = vpop.f32.mrf.mxu0 }
 0x54e   : > { %v2990_v5 = vpop.f32.mrf.mxu1  ;;  %v5840_v6 = vpop.f32.mrf.mxu0 }
 0x54f   : > { %v3079_v7 = vadd.f32 %v3078_v3, %v2990_v5  ;;  %v6386_v3 = vld [vmem:[%s7816_s9 + $0xd0] sm:$0xff]   ;;  %v6388_v5 = vld [vmem:[%s7816_s9 + $0xc8] sm:$0xff]  }
 0x550   : > { %v5820_v9 = vpop.f32.mrf.mxu1  ;;  %v3081_v10 = vpop.f32.mrf.mxu0  ;;  %v6389_v6 = vld [vmem:[%s7816_s9 + $0x88] sm:$0xff]  }
 0x552   : > { %v2993_v12 = vpop.f32.mrf.mxu1  ;;  %v5841_v13 = vpop.f32.mrf.mxu0 }
 0x554   : > { %v5821_v15 = vpop.f32.mrf.mxu1 }
 0x56c   : > { %v3293_v16 = vpop.f32.mrf.mxu0 }
 0x56e   : > { %v3185_v17 = vpop.f32.mrf.mxu1  ;;  %v5880_v18 = vpop.f32.mrf.mxu0 }
 0x56f   : > { %v3191_v19 = vadd.f32 %v3185_v17, %v3079_v7  ;;  %v6390_v7 = vld [vmem:[%s7816_s9 + $0xc0] sm:$0xff]  }
 0x570   : > { %v5860_v20 = vpop.f32.mrf.mxu1  ;;  %v3296_v21 = vpop.f32.mrf.mxu0 }
 0x571   : > { %v3299_v22 = vadd.f32 %v3293_v16, %v3191_v19 }
 0x572   : > { %v3188_v23 = vpop.f32.mrf.mxu1  ;;  %v5881_v24 = vpop.f32.mrf.mxu0 }
 0x573   : > { %v4277_v23 = vld [vmem:[%s7817_s10] sm:$0x1] }
 0x574   : > { %v5861_v25 = vpop.f32.mrf.mxu1 }
 0x58c   : > { %v3508_v26 = vpop.f32.mrf.mxu0 }
 0x58e   : > { %v3399_v27 = vpop.f32.mrf.mxu1  ;;  %v5920_v28 = vpop.f32.mrf.mxu0 }
 0x58f   : > { %v3405_v44 = vadd.f32 %v3399_v27, %v3299_v22 }
 0x590   : > { %v5900_v29 = vpop.f32.mrf.mxu1  ;;  %v3511_v30 = vpop.f32.mrf.mxu0 }
 0x591   : > { %v3514_v46 = vadd.f32 %v3508_v26, %v3405_v44 }
 0x592   : > { %v3402_v31 = vpop.f32.mrf.mxu1  ;;  %v5921_v32 = vpop.f32.mrf.mxu0 }
 0x594   : > { %v5901_v34 = vpop.f32.mrf.mxu1 }
 0x5ac   : > { %v3724_v35 = vpop.f32.mrf.mxu0 }
 0x5ae   : > { %v3616_v36 = vpop.f32.mrf.mxu1  ;;  %v5960_v37 = vpop.f32.mrf.mxu0 }
 0x5af   : > { %v3622_v47 = vadd.f32 %v3616_v36, %v3514_v46 }
 0x5b0   : > { %v5940_v38 = vpop.f32.mrf.mxu1  ;;  %v3727_v40 = vpop.f32.mrf.mxu0 }
 0x5b1   : > { %v3730_v49 = vadd.f32 %v3724_v35, %v3622_v47 }
 0x5b2   : > { %v3619_v41 = vpop.f32.mrf.mxu1  ;;  %v5961_v42 = vpop.f32.mrf.mxu0 }
 0x5b4   : > { %v5941_v43 = vpop.f32.mrf.mxu1 }
 0x5ce   : > { %v3830_v50 = vpop.f32.mrf.mxu1 }
 0x5cf   : > { %v3836_v53 = vadd.f32 %v3830_v50, %v3730_v49 }
 0x5d0   : > { %v5980_v54 = vpop.f32.mrf.mxu1 }
 0x5d1   : > { %v3844_v55 = vadd.f32 %v4992_v51, %v3836_v53 }
 0x5d2   : > { %v3833_v56 = vpop.f32.mrf.mxu1 }
 0x5d3   : > { %v3845_v45 = vmax.f32 %v3844_v55, 0.0 }
 0x5d4   : > { %v5981_v39 = vpop.f32.mrf.mxu1 }
 0x5d5   : > { %v3846_v57 = vpack.c.bf16 %v3845_v45, %v3845_v45 }
 0x5d7   : > { %6019 = vmatmul.mubr.bf16.vlgmr.msra.gmra.mxu1 %v3846_v57  ;;  %v3881_v58 = vshrl.u32 %v3846_v57, 16  ;;  %v4078_v10 = vrot.slane %v3846_v57, 1 }
 0x5d8   : > { %6043 = vmatpush3.bf16.msra.mxu1 %v6376_v48  ;;  %6058 = vmatprep.mubr.msk.bf16.mxu1 %vm6455_vm2, %v6454_v33 }
 0x5d9   : > { %5999 = vmatmul.mubr.bf16.vlgmr.msra.gmra.mxu0 %v3881_v58  ;;  %6044 = vmatprep.subr.bf16.mxu1 %v6454_v33  ;;  %v4186_v9 = vrot.slane %v3881_v58, 1 }
 0x5da   : > { %6023 = vmatpush3.bf16.msra.mxu0 %v6377_v52  ;;  %6038 = vmatprep.mubr.msk.bf16.mxu0 %vm6455_vm2, %v6454_v33 }
 0x5db   : > { %6024 = vmatprep.subr.bf16.mxu0 %v6454_v33 }
 0x5dc   : > { %6045 = vmatpush3.bf16.msra.mxu1 %v6378_v59 }
 0x5dd   : > { %6046 = vmatprep.subr.bf16.mxu1 %v6454_v33 }
 0x5de   : > { %6025 = vmatpush3.bf16.msra.mxu0 %v6379_v60 }
 0x5df   : > { %6026 = vmatprep.subr.bf16.mxu0 %v6454_v33 }
 0x5e0   : > { %6047 = vmatpush3.bf16.msra.mxu1 %v6380_v61 }
 0x5e1   : > { %6048 = vmatprep.subr.bf16.mxu1 %v6454_v33 }
 0x5e2   : > { %6027 = vmatpush3.bf16.msra.mxu0 %v6381_v62 }
 0x5e3   : > { %6028 = vmatprep.subr.bf16.mxu0 %v6454_v33 }
 0x5e4   : > { %6049 = vmatpush3.bf16.msra.mxu1 %v6382_v63 }
 0x5e5   : > { %6050 = vmatprep.subr.bf16.mxu1 %v6454_v33 }
 0x5e6   : > { %6029 = vmatpush3.bf16.msra.mxu0 %v6383_v0 }
 0x5e7   : > { %6030 = vmatprep.subr.bf16.mxu0 %v6454_v33 }
 0x5e8   : > { %6051 = vmatpush3.bf16.msra.mxu1 %v6384_v1 }
 0x5e9   : > { %6052 = vmatprep.subr.bf16.mxu1 %v6454_v33 }
 0x5ea   : > { %6031 = vmatpush3.bf16.msra.mxu0 %v6385_v2 }
 0x5eb   : > { %6032 = vmatprep.subr.bf16.mxu0 %v6454_v33 }
 0x5ec   : > { %6053 = vmatpush3.bf16.msra.mxu1 %v6386_v3 }
 0x5ed   : > { %6054 = vmatprep.subr.bf16.mxu1 %v6454_v33 }
 0x5ee   : > { %6033 = vmatpush3.bf16.msra.mxu0 %v6387_v4 }
 0x5ef   : > { %6034 = vmatprep.subr.bf16.mxu0 %v6454_v33 }
 0x5f0   : > { %6055 = vmatpush3.bf16.msra.mxu1 %v6388_v5 }
 0x5f1   : > { %6056 = vmatprep.subr.bf16.mxu1 %v6454_v33 }
 0x5f2   : > { %6035 = vmatpush3.bf16.msra.mxu0 %v6389_v6 }
 0x5f3   : > { %6036 = vmatprep.subr.bf16.mxu0 %v6454_v33 }
 0x5f4   : > { %6057 = vmatpush3.bf16.msra.mxu1 %v6390_v7 }
 0x5f6   : > { %6037 = vmatpush3.bf16.msra.mxu0 %v6391_v8 }
 0x5f7   : > { %6059 = vmatmul.mubr.bf16.vlgmr.msra.gmra.mxu1 %v4186_v9 }
 0x5f9   : > { %6039 = vmatmul.mubr.bf16.vlgmr.msra.gmra.mxu0 %v4078_v10 }
 0x697   : > { %v4054_v11 = vpop.f32.mrf.mxu1 }
 0x699   : > { %v3966_v12 = vpop.f32.mrf.mxu0  ;;  %v6020_v13 = vpop.f32.mrf.mxu1 }
 0x69a   : > { %v4055_v20 = vadd.f32 %v4054_v11, %v3966_v12 }
 0x69b   : > { %v6000_v14 = vpop.f32.mrf.mxu0  ;;  %v4057_v15 = vpop.f32.mrf.mxu1 }
 0x69d   : > { %v3969_v16 = vpop.f32.mrf.mxu0  ;;  %v6021_v17 = vpop.f32.mrf.mxu1 }
 0x69f   : > { %v6001_v18 = vpop.f32.mrf.mxu0 }
 0x6b7   : > { %v4270_v19 = vpop.f32.mrf.mxu1 }
 0x6b9   : > { %v4162_v33 = vpop.f32.mrf.mxu0  ;;  %v6060_v21 = vpop.f32.mrf.mxu1 }
 0x6ba   : > { %v4168_v22 = vadd.f32 %v4162_v33, %v4055_v20 }
 0x6bb   : > { %v6040_v24 = vpop.f32.mrf.mxu0  ;;  %v4273_v25 = vpop.f32.mrf.mxu1 }
 0x6bc   : > { %v4276_v26 = vadd.f32 %v4270_v19, %v4168_v22 }
 0x6bd   : > { %v4165_v27 = vpop.f32.mrf.mxu0  ;;  %v6061_v28 = vpop.f32.mrf.mxu1 }
 0x6be   : > { %v4278_v29 = vadd.f32 %v4277_v23, %v4276_v26 }
 0x6bf   : > { %v6041_v30 = vpop.f32.mrf.mxu0 }
 0x6c0   : > { %v4279_v31 = vmax.f32 %v4278_v29, 0.0 }
 0x6c2   : > { %4280 = vst [vmem:[%s378_s25] sm:$0x1] %v4279_v31 }
 0x6c3   : > { %6405 = shalt.err (!%p6402_p3)
}
 0x6c4   : > { %s6406_s15 = scalar_lea.hbm %s4292_s14, 16  ;;  %s6410_s25 = scalar_lea.hbm %s7818_s11, 32 }
 0x6c5   : > { %p6407_p4 = scmp.ne.s32.totalorder %s4292_s14, %s6406_s15  ;;  %p6411_p9 = scmp.lt.s32.totalorder %s4292_s14, %s7818_s11 }
 0x6c6   : > { %p6412_p10 = scmp.lt.s32.totalorder %s6410_s25, %s6406_s15 }
 0x6c7   : > { %p6408_p7 = pnand %p6407_p4, %p6555_p5 }
 0x6c8   : > { %p6413_p11 = por %p6412_p10, %p6411_p9 }
 0x6c9   : > { %p6409_p8 = pneg %p6408_p7 }
 0x6cb   : > { %p6414_p12 = pnand %p6413_p11, %p6409_p8 }
 0x6cd   : > { %6417 = shalt.err (!%p6414_p12)
}
 0x6ce   : > { %6064 = dma.vmem_to_hbm [thread:$0]  (%p6555_p5), %s4295_s12, 16, %s4292_s14, %s4282_s16  }
 0x6cf PF: > { %p6070_p13 = scmp.ge.s32.totalorder %s6452_s20, 2  ;;  %s4306_s22 = sand.u32 1, %s6440_s17  }
 0x6d0   : > { %s4307_s19 = scalar_lea.sflag [#allocation3], %s4306_s22 }
 0x6d1   : > { %p6067_p0 = pnand %p6070_p13, %p6559_p6 }
 0x6d3   : > { %p6068_p1 = pneg %p6067_p0 }
 0x6d5   : > { %6435 = dma.done.wait (%p6068_p1), %s4307_s19, 16  }
 0x6d6   : > { %6437 = vsyncadd (%p6068_p1), %s4307_s19, 4294967280  ;;  %s7824_s26 = sld [smem:[#allocation5_spill]]  ;;  %p21_p2 = scmp.ge.s32.totalorder %s6542_s23, 4  }
 0x6d7   : > { %s7825_s19 = sld [smem:[#allocation6_spill]]  ;;  %s7826_s17 = smov %s6444_s18 }
 0x6d8   : > { %s7828_s20 = smov %s6542_s23  ;;  %23 = sbr.rel (!%p21_p2) target bundleno = 3 (0x3), region = 125 }
 0x6dc   : > { %s7827_s18 = smov %s7824_s26 }
 0x6dd   :  { %4311 = vsyncpa [#allocation3], 1 }
 0x6de   :  { %4313 = vsyncpa [#allocation3 + $0x1], 1 }

</bundles_post_ra>
